<compile_context>
chip_gen: v7x
topology: tpu7x:2x2x1
jax: 0.10.0
libtpu: 0.0.40
codegen_flags: <defaults>
</compile_context>

<pallas_src>
import functools

import jax
import jax.numpy as jnp
from jax.experimental import pallas as pl
from jax.experimental.pallas import tpu as pltpu


# ----------------------------- Pallas kernels ------------------------------ #

def conv_stats_kernel(x_ref, w_ref, y_ref, s_ref, lhs_ref, *, kh, kw, t_oy, wo, cin):
    """Conv via in-kernel im2col into a VMEM scratch + ONE merged-K MXU matmul,
    with fused per-channel sum / sum-of-squares partials.

    x_ref:   (1, Hp, Wp, Cin)        padded NHWC image, bf16 (resident per image)
    w_ref:   (kh*kw*Cin, Cout)       weights, bf16 (K merged over all taps)
    y_ref:   (1, t_oy*Wo, Cout)      conv output tile, f32 (pixel-major)
    s_ref:   (1, 1, 2, Cout)         per-tile [sum ; sum_of_squares], f32
    lhs_ref: (t_oy, Wo, kh*kw*Cin)   bf16 VMEM scratch (im2col tile)
    """
    r = pl.program_id(1)
    m_t = t_oy * wo
    row0 = r * t_oy                     # stride == 1 (guarded in the wrapper)

    # Assemble the im2col LHS for this row tile: kh*kw cheap shifted slice-stores.
    for dy in range(kh):
        rows = x_ref[0, pl.ds(row0 + dy, t_oy), :, :]              # (t_oy, Wp, Cin)
        for dx in range(kw):
            k0 = (dy * kw + dx) * cin
            lhs_ref[:, :, k0:k0 + cin] = rows[:, dx:dx + wo, :]    # (t_oy, Wo, Cin)

    # Single MXU matmul, K = kh*kw*Cin (bf16 operands, f32 accumulation).
    lhs = lhs_ref[...].reshape(m_t, kh * kw * cin)
    acc = jnp.dot(lhs, w_ref[...], preferred_element_type=jnp.float32)  # (m_t, Cout)

    y_ref[0] = acc
    # Two direct stores (no concatenate relayout).
    s_ref[0, 0, 0:1, :] = jnp.sum(acc, axis=0, keepdims=True)
    s_ref[0, 0, 1:2, :] = jnp.sum(acc * acc, axis=0, keepdims=True)


def bn_act_kernel(y_ref, scale_ref, shift_ref, o_ref, *, neg_slope):
    """Folded BatchNorm affine + LeakyReLU (all f32 VPU math)."""
    z = y_ref[...] * scale_ref[...] + shift_ref[...]
    o_ref[...] = jnp.where(z > 0, z, neg_slope * z)


# ------------------------------- Wrapper ----------------------------------- #

def _pick_t_oy(ho, wo, target_pixels=256):
    """Largest divisor of Ho giving ~target_pixels output pixels per tile while
    keeping the tile sublane-aligned ((t*Wo) % 8 == 0); falls back to the whole
    image (block dims == full dims is always legal)."""
    divisors = [d for d in range(1, ho + 1) if ho % d == 0]
    aligned = [d for d in divisors if (d * wo) % 8 == 0]
    if not aligned:
        return ho
    target_t = max(1, target_pixels // max(wo, 1))
    under = [d for d in aligned if d <= target_t]
    return max(under) if under else min(aligned)


def dbl_block(x_nchw, w, b, gamma, beta, *, stride, padding,
              eps=1e-5, neg_slope=0.01, target_pixels=256):
    if stride != 1:
        # TODO(synk): stride > 1 path (strided row/col slicing) is untested in Mosaic; guard it.
        raise NotImplementedError("dbl_block Pallas kernel currently supports stride=1 only")

    N, Cin, H, W = x_nchw.shape
    Cout, _, kh, kw = w.shape
    Ho = H + 2 * padding - kh + 1
    Wo = W + 2 * padding - kw + 1
    K = kh * kw * Cin

    # --- layout glue: NCHW -> padded NHWC, bf16 (halves DMA bytes; MXU-native) ---
    x = jnp.transpose(x_nchw, (0, 2, 3, 1))
    xp = jnp.pad(x, ((0, 0), (padding, padding), (padding, padding), (0, 0)))
    xp = xp.astype(jnp.bfloat16)
    Hp, Wp = xp.shape[1], xp.shape[2]

    # weights (Cout, Cin, kh, kw) -> (kh*kw*Cin, Cout): taps merged into K, bf16,
    # Cout left unpadded (padding to 128 lanes only inflates HBM/VMEM traffic).
    wk = jnp.transpose(w, (2, 3, 1, 0)).reshape(K, Cout).astype(jnp.bfloat16)

    # Conv bias is mathematically cancelled by train-mode BatchNorm (mean subtraction).
    del b

    t_oy = _pick_t_oy(Ho, Wo, target_pixels)
    n_r = Ho // t_oy
    m_t = t_oy * Wo

    cparams = pltpu.CompilerParams(
        dimension_semantics=("parallel", "parallel"),
        vmem_limit_bytes=32 * 1024 * 1024)

    # --- kernel 1: conv (merged-K in-kernel im2col) + fused per-channel partial stats ---
    k1 = functools.partial(conv_stats_kernel, kh=kh, kw=kw, t_oy=t_oy, wo=Wo, cin=Cin)
    y, stats = pl.pallas_call(
        k1,
        out_shape=(jax.ShapeDtypeStruct((N, Ho * Wo, Cout), jnp.float32),
                   jax.ShapeDtypeStruct((N, n_r, 2, Cout), jnp.float32)),
        grid=(N, n_r),
        in_specs=[
            pl.BlockSpec((1, Hp, Wp, Cin), lambda n, r: (n, 0, 0, 0)),
            pl.BlockSpec((K, Cout), lambda n, r: (0, 0)),
        ],
        out_specs=(
            pl.BlockSpec((1, m_t, Cout), lambda n, r: (n, r, 0)),
            pl.BlockSpec((1, 1, 2, Cout), lambda n, r: (n, r, 0, 0)),
        ),
        scratch_shapes=[pltpu.VMEM((t_oy, Wo, K), jnp.bfloat16)],
        compiler_params=cparams,
    )(xp, wk)

    # --- tiny O(Cout) reduction + BN affine fold (train-mode / biased variance) ---
    cnt = jnp.float32(N * Ho * Wo)
    s = jnp.sum(stats, axis=(0, 1))                   # (2, Cout)
    mean = s[0] / cnt
    var = jnp.maximum(s[1] / cnt - mean * mean, 0.0)
    inv = jax.lax.rsqrt(var + eps)
    g = gamma.astype(jnp.float32)
    scale = (g * inv).reshape(1, 1, Cout)
    shift = (beta.astype(jnp.float32) - mean * g * inv).reshape(1, 1, Cout)

    # --- kernel 2: BN apply + LeakyReLU, output aliased over the conv buffer ---
    k2 = functools.partial(bn_act_kernel, neg_slope=neg_slope)
    z = pl.pallas_call(
        k2,
        out_shape=jax.ShapeDtypeStruct((N, Ho * Wo, Cout), jnp.float32),
        grid=(N, n_r),
        in_specs=[
            pl.BlockSpec((1, m_t, Cout), lambda n, r: (n, r, 0)),
            pl.BlockSpec((1, 1, Cout), lambda n, r: (0, 0, 0)),
            pl.BlockSpec((1, 1, Cout), lambda n, r: (0, 0, 0)),
        ],
        out_specs=pl.BlockSpec((1, m_t, Cout), lambda n, r: (n, r, 0)),
        input_output_aliases={0: 0},
        compiler_params=cparams,
    )(y, scale, shift)

    # tiny final layout pass back to NCHW (unpadded channels, metadata reshape + small transpose)
    out = z.reshape(N, Ho, Wo, Cout)
    return jnp.transpose(out, (0, 3, 1, 2))


# ------------------------------ Reference ---------------------------------- #

def dbl_block_ref(x_nchw, w, b, gamma, beta, *, stride, padding,
                  eps=1e-5, neg_slope=0.01):
    y = jax.lax.conv_general_dilated(
        x_nchw.astype(jnp.float32), w.astype(jnp.float32),
        window_strides=(stride, stride),
        padding=[(padding, padding), (padding, padding)],
        dimension_numbers=("NCHW", "OIHW", "NCHW"))
    y = y + b.reshape(1, -1, 1, 1)
    mean = jnp.mean(y, axis=(0, 2, 3), keepdims=True)
    var = jnp.mean((y - mean) ** 2, axis=(0, 2, 3), keepdims=True)
    z = (y - mean) * jax.lax.rsqrt(var + eps)
    z = z * gamma.reshape(1, -1, 1, 1) + beta.reshape(1, -1, 1, 1)
    return jnp.where(z > 0, z, neg_slope * z)


# --------------------------------- Main ------------------------------------ #

if __name__ == "__main__":
    # DBLBlock(in_channels=4, out_channels=8, kernel_size=3, stride=1, padding=1)
    N, Cin, H, W = 2, 4, 16, 16
    Cout, kh, kw, stride, padding = 8, 3, 3, 1, 1

    key = jax.random.PRNGKey(0)
    kx, kw_key, kb_key = jax.random.split(key, 3)
    x = jax.random.normal(kx, (N, Cin, H, W), dtype=jnp.float32)

    fan_in = Cin * kh * kw
    bound = 1.0 / (fan_in ** 0.5)
    w = jax.random.uniform(kw_key, (Cout, Cin, kh, kw), jnp.float32, -bound, bound)
    b = jax.random.uniform(kb_key, (Cout,), jnp.float32, -bound, bound)
    gamma = jnp.ones((Cout,), jnp.float32)   # BatchNorm2d weight init
    beta = jnp.zeros((Cout,), jnp.float32)   # BatchNorm2d bias init

    fwd = jax.jit(functools.partial(dbl_block, stride=stride, padding=padding))
    out = jax.block_until_ready(fwd(x, w, b, gamma, beta))

    ref = dbl_block_ref(x, w, b, gamma, beta, stride=stride, padding=padding)
    assert out.shape == (N, Cout, H, W), out.shape
    # bf16 MXU operands (f32 accumulate) -> tolerance loosened vs the pure-f32 reference.
    assert jnp.allclose(out, ref, atol=2e-2, rtol=2e-2), (
        "mismatch vs reference; max |err| = %e" % float(jnp.max(jnp.abs(out - ref))))
    print("KERNEL_OK")
</pallas_src>

<mosaic_0001>
module attributes {stable_mosaic.version = 11 : i64} {
  func.func @conv_stats_kernel(%arg0: i32, %arg1: i32, %arg2: memref<1x18x18x4xbf16, #tpu.memory_space<vmem>>, %arg3: memref<36x8xbf16, #tpu.memory_space<vmem>>, %arg4: memref<1x256x8xf32, #tpu.memory_space<vmem>>, %arg5: memref<1x1x2x8xf32, #tpu.memory_space<vmem>>, %arg6: memref<16x16x36xbf16, #tpu.memory_space<vmem>>) attributes {dimension_semantics = [#tpu.dimension_semantics<parallel>, #tpu.dimension_semantics<parallel>], iteration_bounds = array<i64: 2, 1>, scalar_prefetch = 0 : i64, scratch_operands = 1 : i64, tpu.core_type = #tpu.core_type<tc>, window_params = [{transform_indices = @transform_0, window_bounds = array<i64: 1, 18, 18, 4>}, {pipeline_mode = #tpu.pipeline_mode<synchronous>, transform_indices = @transform_1, window_bounds = array<i64: 36, 8>}, {transform_indices = @transform_2, window_bounds = array<i64: 1, 256, 8>}, {transform_indices = @transform_3, window_bounds = array<i64: 1, 1, 2, 8>}]} {
    %c16_i32 = arith.constant 16 : i32
    %0 = arith.muli %arg1, %c16_i32 : i32
    %c0_i32 = arith.constant 0 : i32
    %1 = arith.addi %0, %c0_i32 : i32
    %c0 = arith.constant 0 : index
    %2 = arith.index_cast %1 : i32 to index
    %c0_0 = arith.constant 0 : index
    %c0_1 = arith.constant 0 : index
    %3 = vector.load %arg2[%c0, %2, %c0_0, %c0_1] : memref<1x18x18x4xbf16, #tpu.memory_space<vmem>>, vector<1x16x18x4xbf16>
    %4 = vector.shape_cast %3 : vector<1x16x18x4xbf16> to vector<16x18x4xbf16>
    %5 = vector.extract_strided_slice %4 {offsets = [0, 0, 0], sizes = [16, 16, 4], strides = [1, 1, 1]} : vector<16x18x4xbf16> to vector<16x16x4xbf16>
    %c0_2 = arith.constant 0 : index
    %c0_3 = arith.constant 0 : index
    %c0_4 = arith.constant 0 : index
    %6 = vector.load %arg6[%c0_2, %c0_3, %c0_4] : memref<16x16x36xbf16, #tpu.memory_space<vmem>>, vector<16x16x4xbf16>
    tpu.vector_store %arg6[%c0_2, %c0_3, %c0_4], %5 {strides = array<i32>} : memref<16x16x36xbf16, #tpu.memory_space<vmem>>, vector<16x16x4xbf16>,
    %7 = vector.extract_strided_slice %4 {offsets = [0, 1, 0], sizes = [16, 16, 4], strides = [1, 1, 1]} : vector<16x18x4xbf16> to vector<16x16x4xbf16>
    %c0_5 = arith.constant 0 : index
    %c0_6 = arith.constant 0 : index
    %c4 = arith.constant 4 : index
    %8 = vector.load %arg6[%c0_5, %c0_6, %c4] : memref<16x16x36xbf16, #tpu.memory_space<vmem>>, vector<16x16x4xbf16>
    tpu.vector_store %arg6[%c0_5, %c0_6, %c4], %7 {strides = array<i32>} : memref<16x16x36xbf16, #tpu.memory_space<vmem>>, vector<16x16x4xbf16>,
    %9 = vector.extract_strided_slice %4 {offsets = [0, 2, 0], sizes = [16, 16, 4], strides = [1, 1, 1]} : vector<16x18x4xbf16> to vector<16x16x4xbf16>
    %c0_7 = arith.constant 0 : index
    %c0_8 = arith.constant 0 : index
    %c8 = arith.constant 8 : index
    %10 = vector.load %arg6[%c0_7, %c0_8, %c8] : memref<16x16x36xbf16, #tpu.memory_space<vmem>>, vector<16x16x4xbf16>
    tpu.vector_store %arg6[%c0_7, %c0_8, %c8], %9 {strides = array<i32>} : memref<16x16x36xbf16, #tpu.memory_space<vmem>>, vector<16x16x4xbf16>,
    %c1_i32 = arith.constant 1 : i32
    %11 = arith.addi %0, %c1_i32 : i32
    %c0_9 = arith.constant 0 : index
    %12 = arith.index_cast %11 : i32 to index
    %c0_10 = arith.constant 0 : index
    %c0_11 = arith.constant 0 : index
    %13 = vector.load %arg2[%c0_9, %12, %c0_10, %c0_11] : memref<1x18x18x4xbf16, #tpu.memory_space<vmem>>, vector<1x16x18x4xbf16>
    %14 = vector.shape_cast %13 : vector<1x16x18x4xbf16> to vector<16x18x4xbf16>
    %15 = vector.extract_strided_slice %14 {offsets = [0, 0, 0], sizes = [16, 16, 4], strides = [1, 1, 1]} : vector<16x18x4xbf16> to vector<16x16x4xbf16>
    %c0_12 = arith.constant 0 : index
    %c0_13 = arith.constant 0 : index
    %c12 = arith.constant 12 : index
    %16 = vector.load %arg6[%c0_12, %c0_13, %c12] : memref<16x16x36xbf16, #tpu.memory_space<vmem>>, vector<16x16x4xbf16>
    tpu.vector_store %arg6[%c0_12, %c0_13, %c12], %15 {strides = array<i32>} : memref<16x16x36xbf16, #tpu.memory_space<vmem>>, vector<16x16x4xbf16>,
    %17 = vector.extract_strided_slice %14 {offsets = [0, 1, 0], sizes = [16, 16, 4], strides = [1, 1, 1]} : vector<16x18x4xbf16> to vector<16x16x4xbf16>
    %c0_14 = arith.constant 0 : index
    %c0_15 = arith.constant 0 : index
    %c16 = arith.constant 16 : index
    %18 = vector.load %arg6[%c0_14, %c0_15, %c16] : memref<16x16x36xbf16, #tpu.memory_space<vmem>>, vector<16x16x4xbf16>
    tpu.vector_store %arg6[%c0_14, %c0_15, %c16], %17 {strides = array<i32>} : memref<16x16x36xbf16, #tpu.memory_space<vmem>>, vector<16x16x4xbf16>,
    %19 = vector.extract_strided_slice %14 {offsets = [0, 2, 0], sizes = [16, 16, 4], strides = [1, 1, 1]} : vector<16x18x4xbf16> to vector<16x16x4xbf16>
    %c0_16 = arith.constant 0 : index
    %c0_17 = arith.constant 0 : index
    %c20 = arith.constant 20 : index
    %20 = vector.load %arg6[%c0_16, %c0_17, %c20] : memref<16x16x36xbf16, #tpu.memory_space<vmem>>, vector<16x16x4xbf16>
    tpu.vector_store %arg6[%c0_16, %c0_17, %c20], %19 {strides = array<i32>} : memref<16x16x36xbf16, #tpu.memory_space<vmem>>, vector<16x16x4xbf16>,
    %c2_i32 = arith.constant 2 : i32
    %21 = arith.addi %0, %c2_i32 : i32
    %c0_18 = arith.constant 0 : index
    %22 = arith.index_cast %21 : i32 to index
    %c0_19 = arith.constant 0 : index
    %c0_20 = arith.constant 0 : index
    %23 = vector.load %arg2[%c0_18, %22, %c0_19, %c0_20] : memref<1x18x18x4xbf16, #tpu.memory_space<vmem>>, vector<1x16x18x4xbf16>
    %24 = vector.shape_cast %23 : vector<1x16x18x4xbf16> to vector<16x18x4xbf16>
    %25 = vector.extract_strided_slice %24 {offsets = [0, 0, 0], sizes = [16, 16, 4], strides = [1, 1, 1]} : vector<16x18x4xbf16> to vector<16x16x4xbf16>
    %c0_21 = arith.constant 0 : index
    %c0_22 = arith.constant 0 : index
    %c24 = arith.constant 24 : index
    %26 = vector.load %arg6[%c0_21, %c0_22, %c24] : memref<16x16x36xbf16, #tpu.memory_space<vmem>>, vector<16x16x4xbf16>
    tpu.vector_store %arg6[%c0_21, %c0_22, %c24], %25 {strides = array<i32>} : memref<16x16x36xbf16, #tpu.memory_space<vmem>>, vector<16x16x4xbf16>,
    %27 = vector.extract_strided_slice %24 {offsets = [0, 1, 0], sizes = [16, 16, 4], strides = [1, 1, 1]} : vector<16x18x4xbf16> to vector<16x16x4xbf16>
    %c0_23 = arith.constant 0 : index
    %c0_24 = arith.constant 0 : index
    %c28 = arith.constant 28 : index
    %28 = vector.load %arg6[%c0_23, %c0_24, %c28] : memref<16x16x36xbf16, #tpu.memory_space<vmem>>, vector<16x16x4xbf16>
    tpu.vector_store %arg6[%c0_23, %c0_24, %c28], %27 {strides = array<i32>} : memref<16x16x36xbf16, #tpu.memory_space<vmem>>, vector<16x16x4xbf16>,
    %29 = vector.extract_strided_slice %24 {offsets = [0, 2, 0], sizes = [16, 16, 4], strides = [1, 1, 1]} : vector<16x18x4xbf16> to vector<16x16x4xbf16>
    %c0_25 = arith.constant 0 : index
    %c0_26 = arith.constant 0 : index
    %c32 = arith.constant 32 : index
    %30 = vector.load %arg6[%c0_25, %c0_26, %c32] : memref<16x16x36xbf16, #tpu.memory_space<vmem>>, vector<16x16x4xbf16>
    tpu.vector_store %arg6[%c0_25, %c0_26, %c32], %29 {strides = array<i32>} : memref<16x16x36xbf16, #tpu.memory_space<vmem>>, vector<16x16x4xbf16>,
    %c0_27 = arith.constant 0 : index
    %c0_28 = arith.constant 0 : index
    %c0_29 = arith.constant 0 : index
    %31 = vector.load %arg6[%c0_27, %c0_28, %c0_29] : memref<16x16x36xbf16, #tpu.memory_space<vmem>>, vector<16x16x36xbf16>
    %32 = vector.shape_cast %31 : vector<16x16x36xbf16> to vector<256x36xbf16>
    %c0_30 = arith.constant 0 : index
    %c0_31 = arith.constant 0 : index
    %33 = vector.load %arg3[%c0_30, %c0_31] : memref<36x8xbf16, #tpu.memory_space<vmem>>, vector<36x8xbf16>
    %cst = arith.constant dense<0.000000e+00> : vector<256x8xf32>
    %34 = tpu.matmul %32, %33, %cst {dimension_numbers = #tpu.dot_dimension_numbers<[1], [0], [0], [1], [0, 0, 1, 1], [], []>} : vector<256x36xbf16>, vector<36x8xbf16>, vector<256x8xf32> -> vector<256x8xf32>
    %c0_32 = arith.constant 0 : index
    %c0_33 = arith.constant 0 : index
    %c0_34 = arith.constant 0 : index
    %35 = vector.load %arg4[%c0_32, %c0_33, %c0_34] : memref<1x256x8xf32, #tpu.memory_space<vmem>>, vector<1x256x8xf32>
    %36 = vector.shape_cast %35 : vector<1x256x8xf32> to vector<256x8xf32>
    %37 = vector.shape_cast %34 : vector<256x8xf32> to vector<1x256x8xf32>
    tpu.vector_store %arg4[%c0_32, %c0_33, %c0_34], %37 {strides = array<i32>} : memref<1x256x8xf32, #tpu.memory_space<vmem>>, vector<1x256x8xf32>,
    %cst_35 = arith.constant dense<0.000000e+00> : vector<8xf32>
    %38 = vector.multi_reduction <add>, %34, %cst_35 [0] : vector<256x8xf32> to vector<8xf32>
    %39 = vector.shape_cast %38 : vector<8xf32> to vector<1x8xf32>
    %c0_36 = arith.constant 0 : index
    %c0_37 = arith.constant 0 : index
    %c0_38 = arith.constant 0 : index
    %c0_39 = arith.constant 0 : index
    %40 = vector.load %arg5[%c0_36, %c0_37, %c0_38, %c0_39] : memref<1x1x2x8xf32, #tpu.memory_space<vmem>>, vector<1x1x1x8xf32>
    %41 = vector.shape_cast %40 : vector<1x1x1x8xf32> to vector<1x8xf32>
    %42 = vector.shape_cast %39 : vector<1x8xf32> to vector<1x1x1x8xf32>
    tpu.vector_store %arg5[%c0_36, %c0_37, %c0_38, %c0_39], %42 {strides = array<i32>} : memref<1x1x2x8xf32, #tpu.memory_space<vmem>>, vector<1x1x1x8xf32>,
    %43 = arith.mulf %34, %34 : vector<256x8xf32>
    %cst_40 = arith.constant dense<0.000000e+00> : vector<8xf32>
    %44 = vector.multi_reduction <add>, %43, %cst_40 [0] : vector<256x8xf32> to vector<8xf32>
    %45 = vector.shape_cast %44 : vector<8xf32> to vector<1x8xf32>
    %c0_41 = arith.constant 0 : index
    %c0_42 = arith.constant 0 : index
    %c1 = arith.constant 1 : index
    %c0_43 = arith.constant 0 : index
    %46 = vector.load %arg5[%c0_41, %c0_42, %c1, %c0_43] : memref<1x1x2x8xf32, #tpu.memory_space<vmem>>, vector<1x1x1x8xf32>
    %47 = vector.shape_cast %46 : vector<1x1x1x8xf32> to vector<1x8xf32>
    %48 = vector.shape_cast %45 : vector<1x8xf32> to vector<1x1x1x8xf32>
    tpu.vector_store %arg5[%c0_41, %c0_42, %c1, %c0_43], %48 {strides = array<i32>} : memref<1x1x2x8xf32, #tpu.memory_space<vmem>>, vector<1x1x1x8xf32>,
    return
  }
  func.func @transform_0(%arg0: i32, %arg1: i32) -> (i32, i32, i32, i32) {
    %c0_i32 = arith.constant 0 : i32
    %c0_i32_0 = arith.constant 0 : i32
    %c0_i32_1 = arith.constant 0 : i32
    %c0_i32_2 = arith.constant 0 : i32
    return %arg0, %c0_i32, %c0_i32_0, %c0_i32_1 : i32, i32, i32, i32
  }
  func.func @transform_1(%arg0: i32, %arg1: i32) -> (i32, i32) {
    %c0_i32 = arith.constant 0 : i32
    %c0_i32_0 = arith.constant 0 : i32
    %c0_i32_1 = arith.constant 0 : i32
    return %c0_i32, %c0_i32_0 : i32, i32
  }
  func.func @transform_2(%arg0: i32, %arg1: i32) -> (i32, i32, i32) {
    %c0_i32 = arith.constant 0 : i32
    %c0_i32_0 = arith.constant 0 : i32
    return %arg0, %arg1, %c0_i32 : i32, i32, i32
  }
  func.func @transform_3(%arg0: i32, %arg1: i32) -> (i32, i32, i32, i32) {
    %c0_i32 = arith.constant 0 : i32
    %c0_i32_0 = arith.constant 0 : i32
    %c0_i32_1 = arith.constant 0 : i32
    return %arg0, %arg1, %c0_i32, %c0_i32_0 : i32, i32, i32, i32
  }
}

module attributes {stable_mosaic.version = 11 : i64} {
  func.func @bn_act_kernel(%arg0: i32, %arg1: i32, %arg2: memref<1x256x8xf32, #tpu.memory_space<vmem>>, %arg3: memref<1x1x8xf32, #tpu.memory_space<vmem>>, %arg4: memref<1x1x8xf32, #tpu.memory_space<vmem>>, %arg5: memref<1x256x8xf32, #tpu.memory_space<vmem>>) attributes {dimension_semantics = [#tpu.dimension_semantics<parallel>, #tpu.dimension_semantics<parallel>], iteration_bounds = array<i64: 2, 1>, scalar_prefetch = 0 : i64, scratch_operands = 0 : i64, tpu.core_type = #tpu.core_type<tc>, window_params = [{transform_indices = @transform_0, window_bounds = array<i64: 1, 256, 8>}, {pipeline_mode = #tpu.pipeline_mode<synchronous>, transform_indices = @transform_1, window_bounds = array<i64: 1, 1, 8>}, {pipeline_mode = #tpu.pipeline_mode<synchronous>, transform_indices = @transform_2, window_bounds = array<i64: 1, 1, 8>}, {transform_indices = @transform_3, window_bounds = array<i64: 1, 256, 8>}]} {
    %c0 = arith.constant 0 : index
    %c0_0 = arith.constant 0 : index
    %c0_1 = arith.constant 0 : index
    %0 = vector.load %arg2[%c0, %c0_0, %c0_1] : memref<1x256x8xf32, #tpu.memory_space<vmem>>, vector<1x256x8xf32>
    %c0_2 = arith.constant 0 : index
    %c0_3 = arith.constant 0 : index
    %c0_4 = arith.constant 0 : index
    %1 = vector.load %arg3[%c0_2, %c0_3, %c0_4] : memref<1x1x8xf32, #tpu.memory_space<vmem>>, vector<1x1x8xf32>
    %2 = vector.broadcast %1 : vector<1x1x8xf32> to vector<1x256x8xf32>
    %3 = arith.mulf %0, %2 : vector<1x256x8xf32>
    %c0_5 = arith.constant 0 : index
    %c0_6 = arith.constant 0 : index
    %c0_7 = arith.constant 0 : index
    %4 = vector.load %arg4[%c0_5, %c0_6, %c0_7] : memref<1x1x8xf32, #tpu.memory_space<vmem>>, vector<1x1x8xf32>
    %5 = vector.broadcast %4 : vector<1x1x8xf32> to vector<1x256x8xf32>
    %6 = arith.addf %3, %5 : vector<1x256x8xf32>
    %cst = arith.constant 0.000000e+00 : f32
    %7 = vector.broadcast %cst : f32 to vector<1x256x8xf32>
    %8 = arith.cmpf ogt, %6, %7 : vector<1x256x8xf32>
    %cst_8 = arith.constant 0.00999999977 : f32
    %9 = vector.broadcast %cst_8 : f32 to vector<1x256x8xf32>
    %10 = arith.mulf %9, %6 : vector<1x256x8xf32>
    %11 = arith.select %8, %6, %10 : vector<1x256x8xi1>, vector<1x256x8xf32>
    %c0_9 = arith.constant 0 : index
    %c0_10 = arith.constant 0 : index
    %c0_11 = arith.constant 0 : index
    %12 = vector.load %arg5[%c0_9, %c0_10, %c0_11] : memref<1x256x8xf32, #tpu.memory_space<vmem>>, vector<1x256x8xf32>
    tpu.vector_store %arg5[%c0_9, %c0_10, %c0_11], %11 {strides = array<i32>} : memref<1x256x8xf32, #tpu.memory_space<vmem>>, vector<1x256x8xf32>,
    return
  }
  func.func @transform_0(%arg0: i32, %arg1: i32) -> (i32, i32, i32) {
    %c0_i32 = arith.constant 0 : i32
    %c0_i32_0 = arith.constant 0 : i32
    return %arg0, %arg1, %c0_i32 : i32, i32, i32
  }
  func.func @transform_1(%arg0: i32, %arg1: i32) -> (i32, i32, i32) {
    %c0_i32 = arith.constant 0 : i32
    %c0_i32_0 = arith.constant 0 : i32
    %c0_i32_1 = arith.constant 0 : i32
    %c0_i32_2 = arith.constant 0 : i32
    return %c0_i32, %c0_i32_0, %c0_i32_1 : i32, i32, i32
  }
  func.func @transform_2(%arg0: i32, %arg1: i32) -> (i32, i32, i32) {
    %c0_i32 = arith.constant 0 : i32
    %c0_i32_0 = arith.constant 0 : i32
    %c0_i32_1 = arith.constant 0 : i32
    %c0_i32_2 = arith.constant 0 : i32
    return %c0_i32, %c0_i32_0, %c0_i32_1 : i32, i32, i32
  }
  func.func @transform_3(%arg0: i32, %arg1: i32) -> (i32, i32, i32) {
    %c0_i32 = arith.constant 0 : i32
    %c0_i32_0 = arith.constant 0 : i32
    return %arg0, %arg1, %c0_i32 : i32, i32, i32
  }
}

</mosaic_0001>

<bundles_post_ra>
// kernel: dbl_block.3
= control target key start
LH: loop header
LB: loop body
LE: loop exit
PB: predicated region body
PF: predicated region fallthrough
CT: control target
= control target key end

     0   :  { %s619_s12 = smov 0   ;;  %s621_s13 = smov 0   ;;  %s883_s0 = inlined_call_operand.vmem [shape: f32[2,256,8], index: 0, kind: input, shape index: {}, may-alias: {0,3}]   ;;  %s884_s1 = inlined_call_operand.vmem [shape: f32[1,1,8], index: 1, kind: input, shape index: {}]   ;;  %s885_s2 = inlined_call_operand.vmem [shape: f32[1,1,8], index: 2, kind: input, shape index: {}]   ;;  %s886_s3 = inlined_call_operand.vmem [shape: f32[2,256,8], index: 3, kind: output, shape index: {}, may-alias: {0,3}]  }
   0x1   :  { %s623_s14 = smov 0  }
   0x2 LB: > { %s25_s15 = sadd.s32 1, %s593_s13  ;;  %p540_p0 = scmp.ge.s32.totalorder %s597_s14, 1  ;;  %s597_s14 = sphi %s623_s14, %s13_s14   ;;  %s593_s13 = sphi %s621_s13, %s888_s13   ;;  %s589_s12 = sphi %s619_s12, %s887_s12  }
   0x3   : > { %p27_p1 = scmp.ge.s32.totalorder %s25_s15, 2  ;;  %p158_p2 = scmp.lt.s32.totalorder %s597_s14, 3 }
   0x5   : > { %s890_s15 = smov (%p27_p1, %s25_s15), 0  ;;  %p159_p3 = pnand %p540_p0, %p158_p2 }
   0x6   : > { %p191_p4 = scmp.lt.s32.totalorder (!%p159_p3), %s589_s12, 1  ;;  %v643_v0 = vld [vmem:[%s884_s1] ss:$0 sm:$0xff] (!%p159_p3)  ;;  %vm416_vm0 = vcmask (!%p159_p3), 64512  }
   0x7   : > { %162 = sbr.rel (%p159_p3) target bundleno = 62 (0x3e), region = 32  ;;  %v655_v1 = vld [vmem:[%s885_s2] ss:$0 sm:$0xff] (!%p159_p3) }
   0xe   : > { %s892_s12 = smov (!%p191_p4, %s589_s12), 1 }
   0xf   : > { %s549_s16 = sshll.u32 %s892_s12, 8 }
  0x10   : > { %s650_s21 = scalar_lea.vmem %s883_s0, %s549_s16  ;;  %s692_s26 = scalar_lea.vmem %s886_s3, %s549_s16 }
  0x11   : > { %v210_v2 = vld [vmem:[%s650_s21] sm:$0xff]  ;;  %v211_v3 = vld [vmem:[%s650_s21 + $0x8] sm:$0xff]  ;;  %v212_v4 = vld [vmem:[%s650_s21 + $0x10] sm:$0xff] }
  0x12   : > { %v213_v5 = vld [vmem:[%s650_s21 + $0x18] sm:$0xff]  ;;  %v214_v6 = vld [vmem:[%s650_s21 + $0x20] sm:$0xff]  ;;  %v215_v7 = vld [vmem:[%s650_s21 + $0x28] sm:$0xff]  ;;  %v249_v8 = vmul.f32 %v643_v0, %v210_v2  ;;  %v250_v9 = vmul.f32 %v643_v0, %v211_v3  ;;  %v251_v10 = vmul.f32 %v643_v0, %v212_v4 }
  0x13   : > { %v216_v11 = vld [vmem:[%s650_s21 + $0x30] sm:$0xff]  ;;  %v217_v12 = vld [vmem:[%s650_s21 + $0x38] sm:$0xff]  ;;  %v218_v13 = vld [vmem:[%s650_s21 + $0x40] sm:$0xff]  ;;  %v252_v14 = vmul.f32 %v643_v0, %v213_v5  ;;  %v253_v15 = vmul.f32 %v643_v0, %v214_v6  ;;  %v254_v16 = vmul.f32 %v643_v0, %v215_v7 }
  0x14   : > { %v219_v17 = vld [vmem:[%s650_s21 + $0x48] sm:$0xff]  ;;  %v288_v18 = vadd.f32 %v655_v1, %v249_v8  ;;  %v289_v19 = vadd.f32 %v655_v1, %v250_v9  ;;  %v290_v20 = vadd.f32 %v655_v1, %v251_v10  ;;  %v255_v21 = vmul.f32 %v643_v0, %v216_v11  ;;  %v220_v29 = vld [vmem:[%s650_s21 + $0x50] sm:$0xff]  ;;  %v221_v36 = vld [vmem:[%s650_s21 + $0x58] sm:$0xff] }
  0x15   : > { %v291_v22 = vadd.f32 %v655_v1, %v252_v14  ;;  %v292_v23 = vadd.f32 %v655_v1, %v253_v15  ;;  %v293_v24 = vadd.f32 %v655_v1, %v254_v16  ;;  %v256_v25 = vmul.f32 %v643_v0, %v217_v12  ;;  %v222_v37 = vld [vmem:[%s650_s21 + $0x60] sm:$0xff]  ;;  %v223_v38 = vld [vmem:[%s650_s21 + $0x68] sm:$0xff]  ;;  %v224_v39 = vld [vmem:[%s650_s21 + $0x70] sm:$0xff] }
  0x16   : > { %vm320_vm1 = vcmp.gt.f32.partialorder %v288_v18, 0.0  ;;  %v352_v26 = vmul.f32 0.01, %v288_v18  ;;  %v294_v27 = vadd.f32 %v655_v1, %v255_v21  ;;  %v257_v28 = vmul.f32 %v643_v0, %v218_v13  ;;  %v225_v40 = vld [vmem:[%s650_s21 + $0x78] sm:$0xff]  ;;  %v700_v41 = vld [vmem:[%s650_s21 + $0x80] sm:$0xff]  ;;  %v703_v42 = vld [vmem:[%s650_s21 + $0x88] sm:$0xff] }
  0x17   : > { %vm321_vm2 = vcmp.gt.f32.partialorder %v289_v19, 0.0  ;;  %v353_v30 = vmul.f32 0.01, %v289_v19  ;;  %v295_v31 = vadd.f32 %v655_v1, %v256_v25  ;;  %v258_v32 = vmul.f32 %v643_v0, %v219_v17  ;;  %v706_v43 = vld [vmem:[%s650_s21 + $0x90] sm:$0xff]  ;;  %v709_v44 = vld [vmem:[%s650_s21 + $0x98] sm:$0xff]  ;;  %v712_v45 = vld [vmem:[%s650_s21 + $0xa0] sm:$0xff] }
  0x18   : > { %v384_v33 = vsel %vm320_vm1, %v288_v18, %v352_v26  ;;  %vm322_vm3 = vcmp.gt.f32.partialorder %v290_v20, 0.0  ;;  %v354_v34 = vmul.f32 0.01, %v290_v20  ;;  %v296_v35 = vadd.f32 %v655_v1, %v257_v28  ;;  %v715_v46 = vld [vmem:[%s650_s21 + $0xa8] sm:$0xff]  ;;  %v718_v47 = vld [vmem:[%s650_s21 + $0xb0] sm:$0xff]  ;;  %v721_v48 = vld [vmem:[%s650_s21 + $0xb8] sm:$0xff] }
  0x19   : > { %v724_v49 = vld [vmem:[%s650_s21 + $0xc0] sm:$0xff]  ;;  %v727_v50 = vld [vmem:[%s650_s21 + $0xc8] sm:$0xff]  ;;  %v730_v51 = vld [vmem:[%s650_s21 + $0xd0] sm:$0xff]  ;;  %v385_v52 = vsel %vm321_vm2, %v289_v19, %v353_v30  ;;  %vm323_vm4 = vcmp.gt.f32.partialorder %v291_v22, 0.0  ;;  %v355_v53 = vmul.f32 0.01, %v291_v22  ;;  %v297_v54 = vadd.f32 %v655_v1, %v258_v32 }
  0x1a   : > { %v735_v55 = vld [vmem:[%s650_s21 + $0xd8] sm:$0xff]  ;;  %v738_v56 = vld [vmem:[%s650_s21 + $0xe0] sm:$0xff]  ;;  %v741_v57 = vld [vmem:[%s650_s21 + $0xe8] sm:$0xff]  ;;  %v386_v58 = vsel %vm322_vm3, %v290_v20, %v354_v34  ;;  %vm324_vm5 = vcmp.gt.f32.partialorder %v292_v23, 0.0  ;;  %v356_v59 = vmul.f32 0.01, %v292_v23  ;;  %v259_v60 = vmul.f32 %v643_v0, %v220_v29 }
  0x1b   : > { %v746_v61 = vld [vmem:[%s650_s21 + $0xf0] sm:$0xff]  ;;  %v749_v62 = vld [vmem:[%s650_s21 + $0xf8] sm:$0xff]  ;;  %v387_v63 = vsel %vm323_vm4, %v291_v22, %v355_v53  ;;  %vm325_vm6 = vcmp.gt.f32.partialorder %v293_v24, 0.0  ;;  %v357_v2 = vmul.f32 0.01, %v293_v24  ;;  %vm326_vm7 = vcmp.gt.f32.partialorder %v294_v27, 0.0 }
  0x1c   : > { %417 = vst.msk [vmem:[%s692_s26] sm:$0xff] %vm416_vm0, %v384_v33  ;;  %418 = vst.msk [vmem:[%s692_s26 + $0x8] sm:$0xff] %vm416_vm0, %v385_v52  ;;  %v388_v3 = vsel %vm324_vm5, %v292_v23, %v356_v59  ;;  %v358_v4 = vmul.f32 0.01, %v294_v27  ;;  %vm327_vm8 = vcmp.gt.f32.partialorder %v295_v31, 0.0  ;;  %vm328_vm9 = vcmp.gt.f32.partialorder %v296_v35, 0.0 }
  0x1d   : > { %419 = vst.msk [vmem:[%s692_s26 + $0x10] sm:$0xff] %vm416_vm0, %v386_v58  ;;  %420 = vst.msk [vmem:[%s692_s26 + $0x18] sm:$0xff] %vm416_vm0, %v387_v63  ;;  %v359_v5 = vmul.f32 0.01, %v295_v31  ;;  %v389_v6 = vsel %vm325_vm6, %v293_v24, %v357_v2  ;;  %v360_v7 = vmul.f32 0.01, %v296_v35  ;;  %v298_v11 = vadd.f32 %v655_v1, %v259_v60 }
  0x1e   : > { %421 = vst.msk [vmem:[%s692_s26 + $0x20] sm:$0xff] %vm416_vm0, %v388_v3  ;;  %vm329_vm10 = vcmp.gt.f32.partialorder %v297_v54, 0.0  ;;  %422 = vst.msk [vmem:[%s692_s26 + $0x28] sm:$0xff] %vm416_vm0, %v389_v6  ;;  %v390_v8 = vsel %vm326_vm7, %v294_v27, %v358_v4  ;;  %v361_v10 = vmul.f32 0.01, %v297_v54  ;;  %v260_v13 = vmul.f32 %v643_v0, %v221_v36 }
  0x1f   : > { %v391_v9 = vsel %vm327_vm8, %v295_v31, %v359_v5  ;;  %423 = vst.msk [vmem:[%s692_s26 + $0x30] sm:$0xff] %vm416_vm0, %v390_v8  ;;  %v392_v12 = vsel %vm328_vm9, %v296_v35, %v360_v7  ;;  %v261_v14 = vmul.f32 %v643_v0, %v222_v37  ;;  %v262_v15 = vmul.f32 %v643_v0, %v223_v38 }
  0x20   : > { %424 = vst.msk [vmem:[%s692_s26 + $0x38] sm:$0xff] %vm416_vm0, %v391_v9  ;;  %425 = vst.msk [vmem:[%s692_s26 + $0x40] sm:$0xff] %vm416_vm0, %v392_v12  ;;  %v393_v16 = vsel %vm329_vm10, %v297_v54, %v361_v10  ;;  %vm330_vm11 = vcmp.gt.f32.partialorder %v298_v11, 0.0  ;;  %v362_v17 = vmul.f32 0.01, %v298_v11  ;;  %v263_v18 = vmul.f32 %v643_v0, %v224_v39 }
  0x21   : > { %426 = vst.msk [vmem:[%s692_s26 + $0x48] sm:$0xff] %vm416_vm0, %v393_v16  ;;  %v299_v19 = vadd.f32 %v655_v1, %v260_v13  ;;  %v300_v20 = vadd.f32 %v655_v1, %v261_v14  ;;  %v301_v21 = vadd.f32 %v655_v1, %v262_v15  ;;  %v264_v22 = vmul.f32 %v643_v0, %v225_v40 }
  0x22   : > { %v394_v23 = vsel %vm330_vm11, %v298_v11, %v362_v17  ;;  %v302_v24 = vadd.f32 %v655_v1, %v263_v18  ;;  %v265_v25 = vmul.f32 %v643_v0, %v700_v41  ;;  %v266_v26 = vmul.f32 %v643_v0, %v703_v42 }
  0x23   : > { %427 = vst.msk [vmem:[%s692_s26 + $0x50] sm:$0xff] %vm416_vm0, %v394_v23  ;;  %vm331_vm12 = vcmp.gt.f32.partialorder %v299_v19, 0.0  ;;  %v363_v27 = vmul.f32 0.01, %v299_v19  ;;  %vm332_vm13 = vcmp.gt.f32.partialorder %v300_v20, 0.0  ;;  %vm333_vm14 = vcmp.gt.f32.partialorder %v301_v21, 0.0 }
  0x24   : > { %v364_v28 = vmul.f32 0.01, %v300_v20  ;;  %v365_v29 = vmul.f32 0.01, %v301_v21  ;;  %vm334_vm15 = vcmp.gt.f32.partialorder %v302_v24, 0.0  ;;  %v303_v33 = vadd.f32 %v655_v1, %v264_v22 }
  0x25   : > { %v366_v30 = vmul.f32 0.01, %v302_v24  ;;  %v395_v31 = vsel %vm331_vm12, %v299_v19, %v363_v27  ;;  %v304_v34 = vadd.f32 %v655_v1, %v265_v25  ;;  %v305_v37 = vadd.f32 %v655_v1, %v266_v26 }
  0x26   : > { %v396_v32 = vsel %vm332_vm13, %v300_v20, %v364_v28  ;;  %428 = vst.msk [vmem:[%s692_s26 + $0x58] sm:$0xff] %vm416_vm0, %v395_v31  ;;  %v397_v35 = vsel %vm333_vm14, %v301_v21, %v365_v29  ;;  %v267_v38 = vmul.f32 %v643_v0, %v706_v43  ;;  %vm335_vm1 = vcmp.gt.f32.partialorder %v303_v33, 0.0 }
  0x27   : > { %429 = vst.msk [vmem:[%s692_s26 + $0x60] sm:$0xff] %vm416_vm0, %v396_v32  ;;  %v398_v36 = vsel %vm334_vm15, %v302_v24, %v366_v30  ;;  %430 = vst.msk [vmem:[%s692_s26 + $0x68] sm:$0xff] %vm416_vm0, %v397_v35  ;;  %v367_v39 = vmul.f32 0.01, %v303_v33  ;;  %vm336_vm2 = vcmp.gt.f32.partialorder %v304_v34, 0.0  ;;  %vm337_vm3 = vcmp.gt.f32.partialorder %v305_v37, 0.0 }
  0x28   : > { %431 = vst.msk [vmem:[%s692_s26 + $0x70] sm:$0xff] %vm416_vm0, %v398_v36  ;;  %v368_v40 = vmul.f32 0.01, %v304_v34  ;;  %v369_v41 = vmul.f32 0.01, %v305_v37  ;;  %v306_v42 = vadd.f32 %v655_v1, %v267_v38  ;;  %v268_v52 = vmul.f32 %v643_v0, %v709_v44 }
  0x29   : > { %v399_v53 = vsel %vm335_vm1, %v303_v33, %v367_v39  ;;  %v269_v43 = vmul.f32 %v643_v0, %v712_v45  ;;  %v270_v58 = vmul.f32 %v643_v0, %v715_v46  ;;  %v271_v45 = vmul.f32 %v643_v0, %v718_v47 }
  0x2a   : > { %v400_v54 = vsel %vm336_vm2, %v304_v34, %v368_v40  ;;  %432 = vst.msk [vmem:[%s692_s26 + $0x78] sm:$0xff] %vm416_vm0, %v399_v53  ;;  %v401_v59 = vsel %vm337_vm3, %v305_v37, %v369_v41  ;;  %vm338_vm4 = vcmp.gt.f32.partialorder %v306_v42, 0.0  ;;  %v370_v60 = vmul.f32 0.01, %v306_v42 }
  0x2b   : > { %433 = vst.msk [vmem:[%s692_s26 + $0x80] sm:$0xff] %vm416_vm0, %v400_v54  ;;  %v307_v63 = vadd.f32 %v655_v1, %v268_v52  ;;  %434 = vst.msk [vmem:[%s692_s26 + $0x88] sm:$0xff] %vm416_vm0, %v401_v59  ;;  %v308_v44 = vadd.f32 %v655_v1, %v269_v43  ;;  %v309_v2 = vadd.f32 %v655_v1, %v270_v58 }
  0x2c   : > { %v272_v46 = vmul.f32 %v643_v0, %v721_v48  ;;  %v402_v3 = vsel %vm338_vm4, %v306_v42, %v370_v60  ;;  %v273_v5 = vmul.f32 %v643_v0, %v724_v49  ;;  %v310_v47 = vadd.f32 %v655_v1, %v271_v45 }
  0x2d   : > { %vm339_vm5 = vcmp.gt.f32.partialorder %v307_v63, 0.0  ;;  %v371_v4 = vmul.f32 0.01, %v307_v63  ;;  %435 = vst.msk [vmem:[%s692_s26 + $0x90] sm:$0xff] %vm416_vm0, %v402_v3  ;;  %vm340_vm6 = vcmp.gt.f32.partialorder %v308_v44, 0.0  ;;  %vm341_vm7 = vcmp.gt.f32.partialorder %v309_v2, 0.0 }
  0x2e   : > { %v372_v6 = vmul.f32 0.01, %v308_v44  ;;  %v373_v7 = vmul.f32 0.01, %v309_v2  ;;  %v311_v9 = vadd.f32 %v655_v1, %v272_v46  ;;  %v312_v48 = vadd.f32 %v655_v1, %v273_v5 }
  0x2f   : > { %v403_v8 = vsel %vm339_vm5, %v307_v63, %v371_v4  ;;  %v274_v49 = vmul.f32 %v643_v0, %v727_v50  ;;  %v275_v12 = vmul.f32 %v643_v0, %v730_v51  ;;  %vm342_vm8 = vcmp.gt.f32.partialorder %v310_v47, 0.0 }
  0x30   : > { %436 = vst.msk [vmem:[%s692_s26 + $0x98] sm:$0xff] %vm416_vm0, %v403_v8  ;;  %v404_v10 = vsel %vm340_vm6, %v308_v44, %v372_v6  ;;  %v405_v11 = vsel %vm341_vm7, %v309_v2, %v373_v7  ;;  %v374_v13 = vmul.f32 0.01, %v310_v47  ;;  %vm343_vm9 = vcmp.gt.f32.partialorder %v311_v9, 0.0 }
  0x31   : > { %437 = vst.msk [vmem:[%s692_s26 + $0xa0] sm:$0xff] %vm416_vm0, %v404_v10  ;;  %438 = vst.msk [vmem:[%s692_s26 + $0xa8] sm:$0xff] %vm416_vm0, %v405_v11  ;;  %v375_v14 = vmul.f32 0.01, %v311_v9  ;;  %vm344_vm10 = vcmp.gt.f32.partialorder %v312_v48, 0.0  ;;  %v313_v16 = vadd.f32 %v655_v1, %v274_v49  ;;  %v314_v50 = vadd.f32 %v655_v1, %v275_v12 }
  0x32   : > { %v376_v15 = vmul.f32 0.01, %v312_v48  ;;  %v406_v17 = vsel %vm342_vm8, %v310_v47, %v374_v13  ;;  %v276_v51 = vmul.f32 %v643_v0, %v735_v55  ;;  %v277_v19 = vmul.f32 %v643_v0, %v738_v56 }
  0x33   : > { %v407_v18 = vsel %vm343_vm9, %v311_v9, %v375_v14  ;;  %439 = vst.msk [vmem:[%s692_s26 + $0xb0] sm:$0xff] %vm416_vm0, %v406_v17  ;;  %vm345_vm11 = vcmp.gt.f32.partialorder %v313_v16, 0.0  ;;  %v377_v21 = vmul.f32 0.01, %v313_v16  ;;  %vm346_vm12 = vcmp.gt.f32.partialorder %v314_v50, 0.0 }
  0x34   : > { %440 = vst.msk [vmem:[%s692_s26 + $0xb8] sm:$0xff] %vm416_vm0, %v407_v18  ;;  %v408_v20 = vsel %vm344_vm10, %v312_v48, %v376_v15  ;;  %v378_v22 = vmul.f32 0.01, %v314_v50  ;;  %v315_v23 = vadd.f32 %v655_v1, %v276_v51  ;;  %v316_v55 = vadd.f32 %v655_v1, %v277_v19 }
  0x35   : > { %441 = vst.msk [vmem:[%s692_s26 + $0xc0] sm:$0xff] %vm416_vm0, %v408_v20  ;;  %v278_v56 = vmul.f32 %v643_v0, %v741_v57  ;;  %v409_v24 = vsel %vm345_vm11, %v313_v16, %v377_v21  ;;  %v279_v25 = vmul.f32 %v643_v0, %v746_v61  ;;  %v280_v26 = vmul.f32 %v643_v0, %v749_v62 }
  0x36   : > { %442 = vst.msk [vmem:[%s692_s26 + $0xc8] sm:$0xff] %vm416_vm0, %v409_v24  ;;  %v410_v27 = vsel %vm346_vm12, %v314_v50, %v378_v22  ;;  %vm347_vm13 = vcmp.gt.f32.partialorder %v315_v23, 0.0  ;;  %v379_v28 = vmul.f32 0.01, %v315_v23  ;;  %vm348_vm14 = vcmp.gt.f32.partialorder %v316_v55, 0.0 }
  0x37   : > { %443 = vst.msk [vmem:[%s692_s26 + $0xd0] sm:$0xff] %vm416_vm0, %v410_v27  ;;  %v380_v29 = vmul.f32 0.01, %v316_v55  ;;  %v317_v57 = vadd.f32 %v655_v1, %v278_v56  ;;  %v318_v30 = vadd.f32 %v655_v1, %v279_v25  ;;  %v319_v61 = vadd.f32 %v655_v1, %v280_v26 }
  0x38   : > { %v411_v0 = vsel %vm347_vm13, %v315_v23, %v379_v28 }
  0x39   : > { %444 = vst.msk [vmem:[%s692_s26 + $0xd8] sm:$0xff] %vm416_vm0, %v411_v0  ;;  %v412_v62 = vsel %vm348_vm14, %v316_v55, %v380_v29  ;;  %vm349_vm15 = vcmp.gt.f32.partialorder %v317_v57, 0.0  ;;  %v381_v31 = vmul.f32 0.01, %v317_v57  ;;  %vm350_vm1 = vcmp.gt.f32.partialorder %v318_v30, 0.0 }
  0x3a   : > { %445 = vst.msk [vmem:[%s692_s26 + $0xe0] sm:$0xff] %vm416_vm0, %v412_v62  ;;  %v382_v32 = vmul.f32 0.01, %v318_v30  ;;  %vm351_vm2 = vcmp.gt.f32.partialorder %v319_v61, 0.0  ;;  %v383_v33 = vmul.f32 0.01, %v319_v61 }
  0x3b   : > { %v413_v34 = vsel %vm349_vm15, %v317_v57, %v381_v31 }
  0x3c   : > { %446 = vst.msk [vmem:[%s692_s26 + $0xe8] sm:$0xff] %vm416_vm0, %v413_v34  ;;  %v414_v35 = vsel %vm350_vm1, %v318_v30, %v382_v32  ;;  %v415_v36 = vsel %vm351_vm2, %v319_v61, %v383_v33 }
  0x3d   : > { %447 = vst.msk [vmem:[%s692_s26 + $0xf0] sm:$0xff] %vm416_vm0, %v414_v35  ;;  %448 = vst.msk [vmem:[%s692_s26 + $0xf8] sm:$0xff] %vm416_vm0, %v415_v36 }
  0x3e PF: > { %s13_s14 = sadd.s32 1, %s597_s14   ;;  %s887_s12 = smov %s593_s13 }
  0x3f   : > { %p10_p5 = scmp.ge.s32.totalorder %s13_s14, 4   ;;  %s888_s13 = smov %s890_s15 }
  0x41   :  { %12 = sbr.rel (!%p10_p5) target bundleno = 2 (0x2), region = 62 }

// kernel: dbl_block.2
= control target key start
LH: loop header
LB: loop body
LE: loop exit
PB: predicated region body
PF: predicated region fallthrough
CT: control target
= control target key end

     0   :  { %s3089_s12 = smov 0   ;;  %s3091_s13 = smov 0   ;;  %s4072_s0 = inlined_call_operand.vmem [shape: bf16[2,18,18,4], index: 0, kind: input, shape index: {}]   ;;  %s4073_s1 = inlined_call_operand.vmem [shape: bf16[36,8], index: 1, kind: input, shape index: {}]   ;;  %s4074_s2 = inlined_call_operand.vmem [shape: f32[2,256,8], index: 2, kind: output, shape index: {0}]   ;;  %s4075_s3 = inlined_call_operand.vmem [shape: f32[2,1,2,8], index: 3, kind: output, shape index: {1}]  }
   0x1   :  { %s3093_s14 = smov 0  }
   0x2 LB: > { %s26_s15 = sadd.s32 1, %s3055_s13  ;;  %p2621_p0 = scmp.ge.s32.totalorder %s3059_s14, 1  ;;  %s3059_s14 = sphi %s3093_s14, %s14_s14   ;;  %s3055_s13 = sphi %s3091_s13, %s4077_s13   ;;  %s3051_s12 = sphi %s3089_s12, %s4076_s12  }
   0x3   : > { %p28_p1 = scmp.ge.s32.totalorder %s26_s15, 2  ;;  %p156_p2 = scmp.lt.s32.totalorder %s3059_s14, 3 }
   0x5   : > { %s4079_s15 = smov (%p28_p1, %s26_s15), 0  ;;  %p157_p3 = pnand %p2621_p0, %p156_p2 }
   0x6   : > { %p191_p4 = scmp.lt.s32.totalorder (!%p157_p3), %s3051_s12, 1  ;;  %vm685_vm0 = vcmask (!%p157_p3), 1046528   ;;  %vm362_vm1 = vcmask (!%p157_p3), 31744   ;;  %s3061_s20 = smov (!%p157_p3), 12   ;;  %vm427_vm2 = vsmask.f32 (!%p157_p3), 7424 }
   0x7   : > { %160 = sbr.rel (%p157_p3) target bundleno = 634 (0x27a), region = 28  ;;  %s3062_s21 = smov (!%p157_p3), 20   ;;  %vm2114_vm3 = vcmask (!%p157_p3), 1041408   ;;  %vm668_vm4 = vcmask (!%p157_p3), 64544   ;;  %vm782_vm5 = vcmask (!%p157_p3), 97344   ;;  %vm979_vm6 = vcmask (!%p157_p3), 130144  }
   0x8   : > { %s3063_s22 = smov (!%p157_p3), 8   ;;  %s3064_s23 = smov (!%p157_p3), 4   ;;  %vm1284_vm7 = vcmask (!%p157_p3), 162944   ;;  %vm1397_vm8 = vcmask (!%p157_p3), 195744   ;;  %vm1594_vm9 = vcmask (!%p157_p3), 228544   ;;  %vm1899_vm10 = vcmask (!%p157_p3), 261344  }
   0x9   : > { %s3065_s24 = smov (!%p157_p3), 16   ;;  %s3066_s25 = smov (!%p157_p3), 24   ;;  %vm2012_vm11 = vcmask (!%p157_p3), 294144   ;;  %vm2065_vm12 = vcmask (!%p157_p3), 293888   ;;  %vm2279_vm13 = vcmask (!%p157_p3), 64512   ;;  %vm2381_vm14 = vcmask (!%p157_p3), 57344  }
   0xa   : > { %s3067_s26 = smov (!%p157_p3), 28   ;;  %s3068_s27 = smov (!%p157_p3), 32  }
   0xe   : > { %s4081_s12 = smov (!%p191_p4, %s3051_s12), 1 }
   0xf   : > { %s2905_s16 = smul.u32 216, %s4081_s12  ;;  %s2839_s7 = sshll.u32 %s4081_s12, 8 }
  0x10   : > { %s3925_s10 = scalar_lea.vmem %s4074_s2, %s2839_s7  ;;  %s2625_s11 = sshll.u32 %s4081_s12, 1 }
  0x11   : > { %s3113_s19 = scalar_lea.vmem %s4072_s0, %s2905_s16  ;;  %s212_s18 = scalar_lea.vmem %s4075_s3, %s2625_s11 }
  0x12   : > { %v2938_v0 = vld [vmem:[%s3113_s19 + $0x18] sm:$0xff]   ;;  %v3117_v1 = vld [vmem:[%s3113_s19 + $0xc] sm:$0xff]   ;;  %v2940_v2 = vld [vmem:[%s3113_s19 + $0x14] ss:$0 sps:$4 sm:$0x11]  }
  0x13   : > { %933 = vrot.lane.b32.xlu1 %v2938_v0, %s3061_s20  ;;  %v2941_v3 = vld [vmem:[%s3113_s19] sm:$0xff]   ;;  %931 = vrot.lane.b32.xlu0 %v3117_v1, %s3061_s20  ;;  %v1301_v4 = vrot.slane %v3117_v1, 1  ;;  %v2943_v5 = vld [vmem:[%s3113_s19 + $0xc] sm:$0xff]   ;;  %v1302_v6 = vrot.slane %v2940_v2, 1  ;;  %v1304_v16 = vrot.slane %v2938_v0, 1  ;;  %v1057_v25 = vshrl.u32 %v2938_v0, 16 }
  0x14   : > { %v2942_v7 = vld [vmem:[%s3113_s19 + $0x8] ss:$0 sps:$4 sm:$0x11]   ;;  %363 = vst.msk [vmem:[#allocation2] sm:$0xff] %vm362_vm1, %v2941_v3  ;;  %v686_v8 = vrot.slane %v2941_v3, 1  ;;  %v689_v9 = vrot.slane %v2943_v5, 1 }
  0x15   : > { %364 = vst.msk [vmem:[#allocation2 + $0x8] sm:$0xff] %vm362_vm1, %v2943_v5  ;;  %v1303_v10 = vsel %vm685_vm0, %v1301_v4, %v1302_v6  ;;  %v687_v11 = vrot.slane %v2942_v7, 1  ;;  %v2944_v12 = vld [vmem:[%s3113_s19 + $0x14] ss:$0 sps:$4 sm:$0x11]   ;;  %v429_v13 = vshrl.u32 %v2941_v3, 16 }
  0x16   : > { %v431_v14 = vshll.u32 %v2941_v3, 16  ;;  %v436_v15 = vshll.u32 %v2942_v7, 16  ;;  %v690_v18 = vrot.slane %v2944_v12, 1  ;;  %v2945_v19 = vld [vmem:[%s3113_s19 + $0x20] ss:$0 sps:$4 sm:$0x11]  }
  0x17   : > { %1349 = vrot.lane.b32.xlu0 %v1303_v10, %s3062_s21  ;;  %v688_v17 = vsel %vm685_vm0, %v686_v8, %v687_v11  ;;  %v441_v20 = vshrl.u32 %v2943_v5, 16  ;;  %v443_v21 = vshll.u32 %v2943_v5, 16  ;;  %v448_v24 = vshll.u32 %v2944_v12, 16  ;;  %v3137_v30 = vld [vmem:[%s3113_s19 + $0x18] sm:$0xff]   ;;  %v3141_v35 = vld [vmem:[%s3113_s19 + $0x24] sm:$0xff]  }
  0x18   : > { %734 = vrot.lane.b32.xlu1 %v688_v17, %s3063_s22  ;;  %v433_v22 = vrot.slane %v431_v14, 1  ;;  %v438_v23 = vrot.slane %v436_v15, 1  ;;  %v691_v26 = vsel %vm685_vm0, %v689_v9, %v690_v18  ;;  %v1305_v27 = vrot.slane %v2945_v19, 1  ;;  %v2948_v41 = vld [vmem:[%s3113_s19 + $0x20] ss:$0 sps:$4 sm:$0x11]  }
  0x19   : > { %v445_v28 = vrot.slane %v443_v21, 1  ;;  %v1059_v29 = vshll.u32 %v2938_v0, 16  ;;  %v450_v32 = vrot.slane %v448_v24, 1  ;;  %v1064_v33 = vshll.u32 %v2945_v19, 16  ;;  %v3159_v54 = vld [vmem:[%s3113_s19 + $0x18] sm:$0xff]   ;;  %v3162_v55 = vld [vmem:[%s3113_s19 + $0x24] sm:$0xff]  }
  0x1a   : > { %v434_v31 = vor.u32 %v433_v22, %v429_v13  ;;  %v1045_v34 = vshrl.u32 %v3117_v1, 16  ;;  %v1047_v38 = vshll.u32 %v3117_v1, 16  ;;  %v1052_v40 = vshll.u32 %v2940_v2, 16  ;;  %v3152_v49 = vld [vmem:[%s3113_s19 + $0x2c] ss:$0 sps:$4 sm:$0x11]  }
  0x1b   : > { %v446_v36 = vor.u32 %v445_v28, %v441_v20  ;;  %v1061_v37 = vrot.slane %v1059_v29, 1  ;;  %v1306_v42 = vsel %vm685_vm0, %v1304_v16, %v1305_v27  ;;  %v1066_v44 = vrot.slane %v1064_v33, 1  ;;  %v3168_v59 = vld [vmem:[%s3113_s19 + $0x20] ss:$0 sps:$4 sm:$0x11]   ;;  %365 = vst.msk [vmem:[#allocation2 + $0x10] sm:$0xff] %vm362_vm1, %v3159_v54 }
  0x1c   : > { %736 = vrot.lane.b32.xlu1 %v691_v26, %s3063_s22  ;;  %v439_v39 = vsel %vm427_vm2, %v434_v31, %v438_v23  ;;  %v1049_v45 = vrot.slane %v1047_v38, 1  ;;  %v1054_v47 = vrot.slane %v1052_v40, 1  ;;  %v1662_v48 = vshll.u32 %v3137_v30, 16  ;;  %366 = vst.msk [vmem:[#allocation2 + $0x18] sm:$0xff] %vm362_vm1, %v3162_v55  ;;  %v2955_v21 = vld [vmem:[%s3113_s19 + $0x30] sm:$0xff]  }
  0x1d   : > { %620 = vrot.lane.b32.xlu0 %v439_v39, %s3064_s23  ;;  %v1062_v43 = vor.u32 %v1061_v37, %v1057_v25  ;;  %v451_v46 = vsel %vm427_vm2, %v446_v36, %v450_v32  ;;  %v1674_v51 = vshll.u32 %v3141_v35, 16  ;;  %v1672_v52 = vshrl.u32 %v3141_v35, 16  ;;  %v2953_v4 = vld [vmem:[%s3113_s19 + $0x2c] ss:$0 sps:$4 sm:$0x11]   ;;  %v2954_v25 = vld [vmem:[%s3113_s19 + $0x24] sm:$0xff]  }
  0x1e   : > { %v1050_v50 = vor.u32 %v1049_v45, %v1045_v34  ;;  %v1679_v53 = vshll.u32 %v3152_v49, 16  ;;  %v1660_v57 = vshrl.u32 %v3137_v30, 16  ;;  %v1664_v61 = vrot.slane %v1662_v48, 1  ;;  %v2957_v26 = vld [vmem:[%s3113_s19 + $0x38] ss:$0 sps:$4 sm:$0x11]  }
  0x1f   : > { %v1067_v56 = vsel %vm427_vm2, %v1062_v43, %v1066_v44  ;;  %v1676_v58 = vrot.slane %v1674_v51, 1  ;;  %v1667_v62 = vshll.u32 %v2948_v41, 16  ;;  %v455_v63 = vshll.u32 %v3159_v54, 16  ;;  %v3205_v32 = vld [vmem:[%s3113_s19 + $0x30] sm:$0xff]   ;;  %v3211_v37 = vld [vmem:[%s3113_s19 + $0x3c] sm:$0xff]  }
  0x20   : > { %1351 = vrot.lane.b32.xlu1 %v1306_v42, %s3062_s21  ;;  %v1055_v60 = vsel %vm427_vm2, %v1050_v50, %v1054_v47  ;;  %v1681_v1 = vrot.slane %v1679_v53, 1  ;;  %v453_v2 = vshrl.u32 %v3159_v54, 16  ;;  %v460_v3 = vshll.u32 %v3168_v59, 16  ;;  %367 = vst.msk [vmem:[#allocation2 + $0x20] sm:$0xff] %vm362_vm1, %v3205_v32  ;;  %368 = vst.msk [vmem:[#allocation2 + $0x28] sm:$0xff] %vm362_vm1, %v3211_v37  ;;  %v3224_v48 = vld [vmem:[%s3113_s19 + $0x3c] sm:$0xff]  }
  0x21   : > { %622 = vrot.lane.b32.xlu0 %v451_v46, %s3064_s23  ;;  %v1677_v0 = vor.u32 %v1676_v58, %v1672_v52  ;;  %v457_v5 = vrot.slane %v455_v63, 1  ;;  %v467_v6 = vshll.u32 %v3162_v55, 16  ;;  %v1665_v7 = vor.u32 %v1664_v61, %v1660_v57  ;;  %v2958_v51 = vld [vmem:[%s3113_s19 + $0x30] sm:$0xff]   ;;  %v3228_v52 = vld [vmem:[%s3113_s19 + $0x44] ss:$0 sps:$4 sm:$0x11]  }
  0x22   : > { %v1669_v8 = vrot.slane %v1667_v62, 1  ;;  %v465_v10 = vshrl.u32 %v3162_v55, 16  ;;  %v462_v12 = vrot.slane %v460_v3, 1  ;;  %v472_v14 = vshll.u32 %v2953_v4, 16 }
  0x23   : > { %v1682_v9 = vsel %vm427_vm2, %v1677_v0, %v1681_v1  ;;  %v458_v11 = vor.u32 %v457_v5, %v453_v2  ;;  %v469_v13 = vrot.slane %v467_v6, 1  ;;  %v1916_v16 = vrot.slane %v3137_v30, 1  ;;  %v2960_v57 = vld [vmem:[%s3113_s19 + $0x38] ss:$0 sps:$4 sm:$0x11]  }
  0x24   : > { %1238 = vrot.lane.b32.xlu1 %v1067_v56, %s3065_s24  ;;  %v1670_v15 = vsel %vm427_vm2, %v1665_v7, %v1669_v8  ;;  %v1917_v17 = vrot.slane %v2948_v41, 1  ;;  %v474_v20 = vrot.slane %v472_v14, 1  ;;  %v1919_v23 = vrot.slane %v3141_v35, 1  ;;  %v3238_v63 = vld [vmem:[%s3113_s19 + $0x38] ss:$0 sps:$4 sm:$0x11]  }
  0x25   : > { %1236 = vrot.lane.b32.xlu0 %v1055_v60, %s3065_s24  ;;  %v463_v18 = vsel %vm427_vm2, %v458_v11, %v462_v12  ;;  %v470_v19 = vor.u32 %v469_v13, %v465_v10  ;;  %v1920_v24 = vrot.slane %v3152_v49, 1  ;;  %v692_v27 = vrot.slane %v3159_v54, 1  ;;  %v3247_v8 = vld [vmem:[%s3113_s19 + $0x48] sm:$0xff]   ;;  %v3251_v11 = vld [vmem:[%s3113_s19 + $0x54] sm:$0xff]  }
  0x26   : > { %v1918_v22 = vsel %vm685_vm0, %v1916_v16, %v1917_v17  ;;  %v695_v29 = vrot.slane %v3162_v55, 1  ;;  %v1083_v31 = vshll.u32 %v2955_v21, 16  ;;  %v693_v34 = vrot.slane %v3168_v59, 1  ;;  %v2965_v12 = vld [vmem:[%s3113_s19 + $0x44] ss:$0 sps:$4 sm:$0x11]  }
  0x27   : > { %v475_v28 = vsel %vm427_vm2, %v470_v19, %v474_v20  ;;  %v1921_v33 = vsel %vm685_vm0, %v1919_v23, %v1920_v24  ;;  %v1071_v36 = vshll.u32 %v2954_v25, 16  ;;  %v1081_v39 = vshrl.u32 %v2955_v21, 16  ;;  %369 = vst.msk [vmem:[#allocation2 + $0x30] sm:$0xff] %vm362_vm1, %v3247_v8  ;;  %370 = vst.msk [vmem:[#allocation2 + $0x38] sm:$0xff] %vm362_vm1, %v3251_v11 }
  0x28   : > { %1548 = vrot.lane.b32.xlu1 %v3141_v35, %s3066_s25  ;;  %v2956_v35 = vld [vmem:[%s3113_s19 + $0x2c] ss:$0 sps:$4 sm:$0x11]   ;;  %v1085_v40 = vrot.slane %v1083_v31, 1  ;;  %v1088_v41 = vshll.u32 %v2957_v26, 16  ;;  %v694_v42 = vsel %vm685_vm0, %v692_v27, %v693_v34  ;;  %v1069_v43 = vshrl.u32 %v2954_v25, 16 }
  0x29   : > { %1546 = vrot.lane.b32.xlu0 %v3137_v30, %s3066_s25  ;;  %v696_v30 = vrot.slane %v2953_v4, 1  ;;  %v1073_v44 = vrot.slane %v1071_v36, 1  ;;  %v1076_v45 = vshll.u32 %v2956_v35, 16  ;;  %v1307_v53 = vrot.slane %v2954_v25, 1  ;;  %v3272_v31 = vld [vmem:[%s3113_s19 + $0x48] sm:$0xff]   ;;  %v3278_v36 = vld [vmem:[%s3113_s19 + $0x3c] sm:$0xff]  }
  0x2a   : > { %v1086_v46 = vor.u32 %v1085_v40, %v1081_v39  ;;  %v1090_v47 = vrot.slane %v1088_v41, 1  ;;  %v1310_v54 = vrot.slane %v2955_v21, 1  ;;  %v1311_v55 = vrot.slane %v2957_v26, 1  ;;  %v3283_v40 = vld [vmem:[%s3113_s19 + $0x44] ss:$0 sps:$4 sm:$0x11]  }
  0x2b   : > { %v697_v38 = vsel %vm685_vm0, %v695_v29, %v696_v30  ;;  %v1074_v49 = vor.u32 %v1073_v44, %v1069_v43  ;;  %v1078_v50 = vrot.slane %v1076_v45, 1  ;;  %v1698_v58 = vshll.u32 %v3224_v48, 16  ;;  %v2969_v43 = vld [vmem:[%s3113_s19 + $0x50] ss:$0 sps:$4 sm:$0x11]  }
  0x2c   : > { %1853 = vrot.lane.b32.xlu1 %v1682_v9, %s3067_s26  ;;  %v1091_v56 = vsel %vm427_vm2, %v1086_v46, %v1090_v47  ;;  %v1308_v60 = vrot.slane %v2956_v35, 1  ;;  %v1686_v61 = vshll.u32 %v2958_v51, 16  ;;  %v1703_v62 = vshll.u32 %v3228_v52, 16  ;;  %v3294_v47 = vld [vmem:[%s3113_s19 + $0x60] sm:$0xff]  }
  0x2d   : > { %1851 = vrot.lane.b32.xlu0 %v1670_v15, %s3067_s26  ;;  %v1079_v59 = vsel %vm427_vm2, %v1074_v49, %v1078_v50  ;;  %v1696_v0 = vshrl.u32 %v3224_v48, 16  ;;  %v1312_v1 = vsel %vm685_vm0, %v1310_v54, %v1311_v55  ;;  %v1700_v2 = vrot.slane %v1698_v58, 1  ;;  %v3299_v49 = vld [vmem:[%s3113_s19 + $0x6c] sm:$0xff]   ;;  %371 = vst.msk [vmem:[#allocation2 + $0x40] sm:$0xff] %vm362_vm1, %v3294_v47 }
  0x2e   : > { %v479_v3 = vshll.u32 %v3205_v32, 16  ;;  %v1309_v4 = vsel %vm685_vm0, %v1307_v53, %v1308_v60  ;;  %v1684_v5 = vshrl.u32 %v2958_v51, 16  ;;  %v1688_v6 = vrot.slane %v1686_v61, 1  ;;  %372 = vst.msk [vmem:[#allocation2 + $0x48] sm:$0xff] %vm362_vm1, %v3299_v49  ;;  %v3316_v60 = vld [vmem:[%s3113_s19 + $0x54] sm:$0xff]  }
  0x2f   : > { %v1691_v7 = vshll.u32 %v2960_v57, 16  ;;  %v1705_v9 = vrot.slane %v1703_v62, 1  ;;  %v484_v10 = vshll.u32 %v3238_v63, 16  ;;  %v491_v13 = vshll.u32 %v3211_v37, 16 }
  0x30   : > { %624 = vrot.lane.b32.xlu1 %v463_v18, %s3064_s23  ;;  %v1701_v14 = vor.u32 %v1700_v2, %v1696_v0  ;;  %v477_v15 = vshrl.u32 %v3205_v32, 16  ;;  %v481_v16 = vrot.slane %v479_v3, 1  ;;  %v1689_v17 = vor.u32 %v1688_v6, %v1684_v5  ;;  %v3319_v62 = vld [vmem:[%s3113_s19 + $0x5c] ss:$0 sps:$4 sm:$0x11]  }
  0x31   : > { %1964 = vrot.lane.b32.xlu0 %v1918_v22, %s3068_s27  ;;  %v1693_v18 = vrot.slane %v1691_v7, 1  ;;  %v486_v19 = vrot.slane %v484_v10, 1  ;;  %v489_v20 = vshrl.u32 %v3211_v37, 16  ;;  %v496_v22 = vshll.u32 %v2965_v12, 16 }
  0x32   : > { %v1706_v23 = vsel %vm427_vm2, %v1701_v14, %v1705_v9  ;;  %v482_v24 = vor.u32 %v481_v16, %v477_v15  ;;  %v1922_v26 = vrot.slane %v2958_v51, 1  ;;  %v1923_v27 = vrot.slane %v2960_v57, 1  ;;  %v2972_v9 = vld [vmem:[%s3113_s19 + $0x50] ss:$0 sps:$4 sm:$0x11]  }
  0x33   : > { %v498_v30 = vrot.slane %v496_v22, 1  ;;  %v1925_v34 = vrot.slane %v3224_v48, 1  ;;  %v1926_v35 = vrot.slane %v3228_v52, 1  ;;  %v702_v39 = vrot.slane %v2965_v12, 1  ;;  %v2995_v12 = vld [vmem:[%s4073_s1 + $0x8] sm:$0xff]  }
  0x34   : > { %626 = vrot.lane.b32.xlu1 %v475_v28, %s3064_s23  ;;  %v487_v28 = vsel %vm427_vm2, %v482_v24, %v486_v19  ;;  %v1107_v44 = vshll.u32 %v3272_v31, 16  ;;  %v699_v46 = vrot.slane %v3238_v63, 1  ;;  %v1105_v50 = vshrl.u32 %v3272_v31, 16  ;;  %v2994_v63 = vld [vmem:[%s4073_s1] sm:$0xff]  }
  0x35   : > { %1966 = vrot.lane.b32.xlu0 %v1921_v33, %s3068_s27  ;;  %v1924_v33 = vsel %vm685_vm0, %v1922_v26, %v1923_v27  ;;  %v1927_v45 = vsel %vm685_vm0, %v1925_v34, %v1926_v35  ;;  %v1112_v52 = vshll.u32 %v2969_v43, 16  ;;  %v1093_v54 = vshrl.u32 %v3278_v36, 16  ;;  %2859 = vmatprep.subr.bf16.mxu0 %v2994_v63  ;;  %v3342_v14 = vld [vmem:[%s3113_s19 + $0x50] ss:$0 sps:$4 sm:$0x11]  }
  0x36   : > { %v1313_v0 = vrot.slane %v3278_v36, 1  ;;  %v1317_v3 = vrot.slane %v2969_v43, 1  ;;  %v1722_v5 = vshll.u32 %v3316_v60, 16  ;;  %2860 = vmatpush3.bf16.msra.mxu0 %v2994_v63  ;;  %v1314_v7 = vrot.slane %v3283_v40, 1  ;;  %2897 = vmatprep.subr.bf16.mxu1 %v2994_v63 }
  0x37   : > { %v1114_v58 = vrot.slane %v1112_v52, 1  ;;  %2900 = vmatpush3.bf16.msra.mxu1 %v2994_v63  ;;  %v1720_v15 = vshrl.u32 %v3316_v60, 16  ;;  %v503_v16 = vshll.u32 %v3247_v8, 16  ;;  %2861 = vmatprep.subr.bf16.mxu0 %v2995_v12  ;;  %v1715_v22 = vshll.u32 %v2972_v9, 16 }
  0x38   : > { %740 = vrot.lane.b32.xlu1 %v697_v38, %s3063_s22  ;;  %v701_v38 = vrot.slane %v3211_v37, 1  ;;  %v1095_v37 = vshll.u32 %v3278_v36, 16  ;;  %v1724_v19 = vrot.slane %v1722_v5, 1  ;;  %2898 = vmatprep.subr.bf16.mxu1 %v2995_v12  ;;  %v508_v27 = vshll.u32 %v3342_v14, 16 }
  0x39   : > { %738 = vrot.lane.b32.xlu0 %v694_v42, %s3063_s22  ;;  %v698_v42 = vrot.slane %v3205_v32, 1  ;;  %v1100_v32 = vshll.u32 %v3283_v40, 16  ;;  %v505_v26 = vrot.slane %v503_v16, 1  ;;  %v1717_v34 = vrot.slane %v1715_v22, 1 }
  0x3a   : > { %v1097_v55 = vrot.slane %v1095_v37, 1  ;;  %2862 = vmatpush3.bf16.msra.mxu0 %v2995_v12  ;;  %v510_v35 = vrot.slane %v508_v27, 1  ;;  %v1932_v52 = vrot.slane %v3319_v62, 1  ;;  %v3420_v16 = vld [vmem:[%s3113_s19 + $0x74] ss:$0 sps:$4 sm:$0x11]  }
  0x3b   : > { %v700_v53 = vsel %vm685_vm0, %v698_v42, %v699_v46  ;;  %2901 = vmatpush3.bf16.msra.mxu1 %v2995_v12 }
  0x3c   : > { %937 = vrot.lane.b32.xlu1 %v2955_v21, %s3061_s20  ;;  %v493_v21 = vrot.slane %v491_v13, 1  ;;  %v1098_v61 = vor.u32 %v1097_v55, %v1093_v54  ;;  %v1727_v13 = vshll.u32 %v3319_v62, 16  ;;  %v704_v54 = vrot.slane %v3247_v8, 1  ;;  %v2980_v62 = vld [vmem:[%s3113_s19 + $0x5c] ss:$0 sps:$4 sm:$0x11]  }
  0x3d   : > { %935 = vrot.lane.b32.xlu0 %v2954_v25, %s3061_s20  ;;  %v1694_v25 = vsel %vm427_vm2, %v1689_v17, %v1693_v18  ;;  %v705_v55 = vrot.slane %v3342_v14, 1 }
  0x3e   : > { %v494_v29 = vor.u32 %v493_v21, %v489_v20  ;;  %v3350_v20 = vld [vmem:[%s3113_s19 + $0x78] sm:$0xff]   ;;  %v1315_v21 = vsel %vm685_vm0, %v1313_v0, %v1314_v7  ;;  %v1729_v24 = vrot.slane %v1727_v13, 1 }
  0x3f   : > { %373 = vst.msk [vmem:[#allocation2 + $0x50] sm:$0xff] %vm362_vm1, %v3350_v20  ;;  %v3407_v7 = vld [vmem:[%s3113_s19 + $0x9c] sm:$0xff]  }
  0x40   : > { %1242 = vrot.lane.b32.xlu1 %v1091_v56, %s3065_s24  ;;  %v499_v41 = vsel %vm427_vm2, %v494_v29, %v498_v30  ;;  %v1102_v56 = vrot.slane %v1100_v32, 1  ;;  %v1725_v29 = vor.u32 %v1724_v19, %v1720_v15  ;;  %v2977_v30 = vld [vmem:[%s3113_s19 + $0x5c] ss:$0 sps:$4 sm:$0x11]   ;;  %v2979_v32 = vld [vmem:[%s3113_s19 + $0x60] sm:$0xff]   ;;  %376 = vst.msk [vmem:[#allocation2 + $0x68] sm:$0xff] %vm362_vm1, %v3407_v7 }
  0x41   : > { %1240 = vrot.lane.b32.xlu0 %v1079_v59, %s3065_s24  ;;  %v3313_v59 = vld [vmem:[%s3113_s19 + $0x48] sm:$0xff]   ;;  %v520_v42 = vshll.u32 %v2977_v30, 16  ;;  %v1129_v0 = vshrl.u32 %v2979_v32, 16  ;;  %v3417_v15 = vld [vmem:[%s3113_s19 + $0x60] sm:$0xff]   ;;  %v1322_v22 = vrot.slane %v2979_v32, 1 }
  0x42   : > { %v1103_v6 = vsel %vm427_vm2, %v1098_v61, %v1102_v56  ;;  %v1708_v10 = vshrl.u32 %v3313_v59, 16  ;;  %v707_v56 = vrot.slane %v3251_v11, 1  ;;  %v1131_v61 = vshll.u32 %v2979_v32, 16 }
  0x44   : > { %1355 = vrot.lane.b32.xlu1 %v1312_v1, %s3062_s21  ;;  %v1316_v1 = vrot.slane %v3272_v31, 1 }
  0x45   : > { %1353 = vrot.lane.b32.xlu0 %v1309_v4, %s3062_s21  ;;  %v1710_v4 = vshll.u32 %v3313_v59, 16 }
  0x46   : > { %v1318_v17 = vsel %vm685_vm0, %v1316_v1, %v1317_v3  ;;  %v1133_v1 = vrot.slane %v1131_v61, 1  ;;  %v706_v3 = vsel %vm685_vm0, %v704_v54, %v705_v55  ;;  %v537_v54 = vshrl.u32 %v3299_v49, 16 }
  0x47   : > { %v1712_v18 = vrot.slane %v1710_v4, 1 }
  0x48   : > { %1552 = vrot.lane.b32.xlu1 %v3224_v48, %s3066_s25  ;;  %v703_v48 = vsel %vm685_vm0, %v701_v38, %v702_v39  ;;  %v3371_v38 = vld [vmem:[%s3113_s19 + $0x84] sm:$0xff]   ;;  %v1730_v39 = vsel %vm427_vm2, %v1725_v29, %v1729_v24 }
  0x49   : > { %1550 = vrot.lane.b32.xlu0 %v2958_v51, %s3066_s25  ;;  %v1109_v51 = vrot.slane %v1107_v44, 1  ;;  %v1928_v44 = vrot.slane %v3313_v59, 1  ;;  %374 = vst.msk [vmem:[#allocation2 + $0x58] sm:$0xff] %vm362_vm1, %v3371_v38 }
  0x4b   : > { %v1110_v57 = vor.u32 %v1109_v51, %v1105_v50  ;;  %v1931_v51 = vrot.slane %v3316_v60, 1 }
  0x4c   : > { %1857 = vrot.lane.b32.xlu1 %v1706_v23, %s3067_s26  ;;  %v2998_v23 = vld [vmem:[%s4073_s1 + $0x10] ss:$0 sps:$4 sm:$0x33]  }
  0x4d   : > { %1855 = vrot.lane.b32.xlu0 %v1694_v25, %s3067_s26  ;;  %v1115_v2 = vsel %vm427_vm2, %v1110_v57, %v1114_v58  ;;  %v501_v25 = vshrl.u32 %v3247_v8, 16  ;;  %2903 = vmatprep.subr.msk.bf16.mxu0 %vm2114_vm3, %v2998_v23  ;;  %v708_v57 = vrot.slane %v2977_v30, 1  ;;  %v3399_v8 = vld [vmem:[%s3113_s19 + $0x90] sm:$0xff]   ;;  %v3433_v30 = vld [vmem:[%s3113_s19 + $0x68] ss:$0 sps:$4 sm:$0x11]  }
  0x4e   : > { %2904 = vmatprep.subr.msk.bf16.mxu1 %vm2114_vm3, %v2998_v23  ;;  %375 = vst.msk [vmem:[#allocation2 + $0x60] sm:$0xff] %vm362_vm1, %v3399_v8 }
  0x4f   : > { %v506_v40 = vor.u32 %v505_v26, %v501_v25  ;;  %v2984_v25 = vld [vmem:[%s3113_s19 + $0x68] ss:$0 sps:$4 sm:$0x11]   ;;  %v1734_v26 = vshll.u32 %v3417_v15, 16 }
  0x50   : > { %628 = vrot.lane.b32.xlu1 %v487_v28, %s3064_s23  ;;  %v2116_v28 = vsel %vm2114_vm3, %v2998_v23, 0 }
  0x51   : > { %1968 = vrot.lane.b32.xlu0 %v1924_v33, %s3068_s27  ;;  %2864 = vmatpush3.bf16.msra.mxu0 %v2116_v28  ;;  %v1713_v33 = vor.u32 %v1712_v18, %v1708_v10  ;;  %v511_v46 = vsel %vm427_vm2, %v506_v40, %v510_v35  ;;  %v1134_v10 = vor.u32 %v1133_v1, %v1129_v0  ;;  %v1732_v35 = vshrl.u32 %v3417_v15, 16 }
  0x52   : > { %2902 = vmatpush3.bf16.msra.mxu1 %v2116_v28  ;;  %v1751_v28 = vshll.u32 %v3420_v16, 16 }
  0x53   : > { %v1718_v43 = vsel %vm427_vm2, %v1713_v33, %v1717_v34  ;;  %v527_v33 = vshll.u32 %v3294_v47, 16 }
  0x54   : > { %630 = vrot.lane.b32.xlu1 %v499_v41, %s3064_s23  ;;  %v1753_v40 = vrot.slane %v1751_v28, 1 }
  0x55   : > { %1970 = vrot.lane.b32.xlu0 %v1927_v45, %s3068_s27  ;;  %v1929_v45 = vrot.slane %v2972_v9, 1  ;;  %v3411_v9 = vld [vmem:[%s3113_s19 + $0x6c] sm:$0xff]  }
  0x56   : > { %v1746_v18 = vshll.u32 %v3411_v9, 16  ;;  %v1744_v27 = vshrl.u32 %v3411_v9, 16 }
  0x57   : > { %v1930_v50 = vsel %vm685_vm0, %v1928_v44, %v1929_v45  ;;  %v525_v44 = vshrl.u32 %v3294_v47, 16  ;;  %v532_v45 = vshll.u32 %v3433_v30, 16 }
  0x58   : > { %744 = vrot.lane.b32.xlu1 %v703_v48, %s3063_s22  ;;  %v522_v48 = vrot.slane %v520_v42, 1  ;;  %v1748_v29 = vrot.slane %v1746_v18, 1 }
  0x59   : > { %742 = vrot.lane.b32.xlu0 %v700_v53, %s3063_s22  ;;  %v2978_v53 = vld [vmem:[%s3113_s19 + $0x54] sm:$0xff]  }
  0x5a   : > { %v1119_v63 = vshll.u32 %v2978_v53, 16  ;;  %v1117_v4 = vshrl.u32 %v2978_v53, 16 }
  0x5c   : > { %941 = vrot.lane.b32.xlu1 %v3272_v31, %s3061_s20  ;;  %v515_v31 = vshll.u32 %v3251_v11, 16  ;;  %v1121_v5 = vrot.slane %v1119_v63, 1  ;;  %v1935_v63 = vrot.slane %v2984_v25, 1 }
  0x5d   : > { %939 = vrot.lane.b32.xlu0 %v3278_v36, %s3061_s20  ;;  %v513_v36 = vshrl.u32 %v3251_v11, 16  ;;  %v709_v11 = vsel %vm685_vm0, %v707_v56, %v708_v57  ;;  %v534_v57 = vrot.slane %v532_v45, 1 }
  0x5e   : > { %v517_v41 = vrot.slane %v515_v31, 1  ;;  %v1122_v13 = vor.u32 %v1121_v5, %v1117_v4  ;;  %v1937_v5 = vrot.slane %v3411_v9, 1 }
  0x60   : > { %1246 = vrot.lane.b32.xlu1 %v1115_v2, %s3065_s24  ;;  %v518_v37 = vor.u32 %v517_v41, %v513_v36  ;;  %v1736_v36 = vrot.slane %v1734_v26, 1 }
  0x61   : > { %1244 = vrot.lane.b32.xlu0 %v1103_v6, %s3065_s24  ;;  %v1124_v6 = vshll.u32 %v2980_v62, 16 }
  0x62   : > { %v523_v58 = vsel %vm427_vm2, %v518_v37, %v522_v48  ;;  %v2989_v37 = vld [vmem:[%s3113_s19 + $0x74] ss:$0 sps:$4 sm:$0x11]   ;;  %v539_v48 = vshll.u32 %v3299_v49, 16 }
  0x63   : > { %v1126_v14 = vrot.slane %v1124_v6, 1  ;;  %v1938_v6 = vrot.slane %v3420_v16, 1  ;;  %v3489_v16 = vld [vmem:[%s3113_s19 + $0x80] ss:$0 sps:$4 sm:$0x11]  }
  0x64   : > { %1359 = vrot.lane.b32.xlu1 %v1318_v17, %s3062_s21  ;;  %v1319_v17 = vrot.slane %v2978_v53, 1  ;;  %v1160_v26 = vshll.u32 %v3489_v16, 16 }
  0x65   : > { %1357 = vrot.lane.b32.xlu0 %v1315_v21, %s3062_s21  ;;  %v1320_v21 = vrot.slane %v2980_v62, 1  ;;  %v1127_v24 = vsel %vm427_vm2, %v1122_v13, %v1126_v14  ;;  %v1934_v62 = vrot.slane %v3417_v15, 1  ;;  %v710_v13 = vrot.slane %v3294_v47, 1  ;;  %v3495_v47 = vld [vmem:[%s3113_s19 + $0x74] ss:$0 sps:$4 sm:$0x11]  }
  0x66   : > { %v711_v14 = vrot.slane %v3433_v30, 1 }
  0x67   : > { %v1321_v34 = vsel %vm685_vm0, %v1319_v17, %v1320_v21  ;;  %v1936_v4 = vsel %vm685_vm0, %v1934_v62, %v1935_v63  ;;  %v714_v17 = vrot.slane %v2989_v37, 1  ;;  %v1939_v21 = vsel %vm685_vm0, %v1937_v5, %v1938_v6  ;;  %v3551_v62 = vld [vmem:[%s3113_s19 + $0x80] ss:$0 sps:$4 sm:$0x11]  }
  0x68   : > { %1556 = vrot.lane.b32.xlu1 %v3316_v60, %s3066_s25  ;;  %v1933_v60 = vsel %vm685_vm0, %v1931_v51, %v1932_v52  ;;  %v3454_v52 = vld [vmem:[%s3113_s19 + $0xb4] sm:$0xff]   ;;  %v712_v28 = vsel %vm685_vm0, %v710_v13, %v711_v14  ;;  %v551_v63 = vshll.u32 %v3350_v20, 16  ;;  %v556_v13 = vshll.u32 %v3551_v62, 16  ;;  %v3004_v14 = vld [vmem:[%s3113_s19 + $0x8c] ss:$0 sps:$4 sm:$0x11]  }
  0x69   : > { %1554 = vrot.lane.b32.xlu0 %v3313_v59, %s3066_s25  ;;  %v2981_v59 = vld [vmem:[%s3113_s19 + $0x68] ss:$0 sps:$4 sm:$0x11]   ;;  %378 = vst.msk [vmem:[#allocation2 + $0x78] sm:$0xff] %vm362_vm1, %v3454_v52 }
  0x6a   : > { %v1136_v2 = vshll.u32 %v2981_v59, 16  ;;  %v1323_v23 = vrot.slane %v2981_v59, 1  ;;  %v544_v59 = vshll.u32 %v2989_v37, 16 }
  0x6c   : > { %1861 = vrot.lane.b32.xlu1 %v1730_v39, %s3067_s26  ;;  %v1138_v12 = vrot.slane %v1136_v2, 1  ;;  %v1324_v31 = vsel %vm685_vm0, %v1322_v22, %v1323_v23  ;;  %v1739_v39 = vshll.u32 %v2984_v25, 16  ;;  %v546_v1 = vrot.slane %v544_v59, 1  ;;  %v3472_v2 = vld [vmem:[%s3113_s19 + $0x78] sm:$0xff]  }
  0x6d   : > { %1859 = vrot.lane.b32.xlu0 %v1718_v43, %s3067_s26  ;;  %v1749_v43 = vor.u32 %v1748_v29, %v1744_v27  ;;  %v1155_v18 = vshll.u32 %v3472_v2, 16  ;;  %v1153_v23 = vshrl.u32 %v3472_v2, 16  ;;  %v1328_v37 = vrot.slane %v3472_v2, 1 }
  0x6e   : > { %v1139_v19 = vsel %vm427_vm2, %v1134_v10, %v1138_v12  ;;  %v1741_v51 = vrot.slane %v1739_v39, 1  ;;  %v3478_v10 = vld [vmem:[%s3113_s19 + $0x6c] sm:$0xff]  }
  0x6f   : > { %v1157_v25 = vrot.slane %v1155_v18, 1  ;;  %v1141_v29 = vshrl.u32 %v3478_v10, 16 }
  0x70   : > { %632 = vrot.lane.b32.xlu1 %v511_v46, %s3064_s23  ;;  %v529_v46 = vrot.slane %v527_v33, 1 }
  0x71   : > { %1972 = vrot.lane.b32.xlu0 %v1930_v50, %s3068_s27  ;;  %v1737_v50 = vor.u32 %v1736_v36, %v1732_v35  ;;  %v1158_v35 = vor.u32 %v1157_v25, %v1153_v23  ;;  %v1162_v36 = vrot.slane %v1160_v26, 1  ;;  %v568_v23 = vshll.u32 %v3004_v14, 16 }
  0x72   : > { %v530_v56 = vor.u32 %v529_v46, %v525_v44  ;;  %v3528_v44 = vld [vmem:[%s3113_s19 + $0x8c] ss:$0 sps:$4 sm:$0x11]  }
  0x73   : > { %v1163_v46 = vsel %vm427_vm2, %v1158_v35, %v1162_v36  ;;  %v3583_v35 = vld [vmem:[%s3113_s19 + $0x90] sm:$0xff]  }
  0x74   : > { %634 = vrot.lane.b32.xlu1 %v523_v58, %s3064_s23  ;;  %v541_v58 = vrot.slane %v539_v48, 1  ;;  %v1329_v48 = vrot.slane %v3489_v16, 1 }
  0x75   : > { %1974 = vrot.lane.b32.xlu0 %v1933_v60, %s3068_s27  ;;  %v1742_v60 = vsel %vm427_vm2, %v1737_v50, %v1741_v51 }
  0x76   : > { %v542_v0 = vor.u32 %v541_v58, %v537_v54  ;;  %v1326_v54 = vrot.slane %v3495_v47, 1 }
  0x78   : > { %748 = vrot.lane.b32.xlu1 %v709_v11, %s3063_s22  ;;  %v535_v11 = vsel %vm427_vm2, %v530_v56, %v534_v57 }
  0x79   : > { %746 = vrot.lane.b32.xlu0 %v706_v3, %s3063_s22 }
  0x7c   : > { %945 = vrot.lane.b32.xlu1 %v2979_v32, %s3061_s20  ;;  %v3449_v32 = vld [vmem:[%s3113_s19 + $0xa8] sm:$0xff]  }
  0x7d   : > { %943 = vrot.lane.b32.xlu0 %v2978_v53, %s3061_s20  ;;  %377 = vst.msk [vmem:[#allocation2 + $0x70] sm:$0xff] %vm362_vm1, %v3449_v32  ;;  %v1754_v53 = vsel %vm427_vm2, %v1749_v43, %v1753_v40 }
  0x80   : > { %1250 = vrot.lane.b32.xlu1 %v1139_v19, %s3065_s24 }
  0x81   : > { %1248 = vrot.lane.b32.xlu0 %v1127_v24, %s3065_s24 }
  0x84   : > { %1363 = vrot.lane.b32.xlu1 %v1324_v31, %s3062_s21  ;;  %v1148_v31 = vshll.u32 %v3495_v47, 16 }
  0x85   : > { %v3441_v41 = vpop.permute.xlu1 %933  ;;  %v932_v42 = vpop.permute.xlu0 %931  ;;  %1361 = vrot.lane.b32.xlu0 %v1321_v34, %s3062_s21  ;;  %v3515_v34 = vld [vmem:[%s3113_s19 + $0x84] sm:$0xff]  }
  0x86   : > { %v1770_v45 = vshll.u32 %v3515_v34, 16  ;;  %v1768_v58 = vshrl.u32 %v3515_v34, 16 }
  0x88   : > { %1560 = vrot.lane.b32.xlu1 %v3411_v9, %s3066_s25  ;;  %v547_v9 = vsel %vm427_vm2, %v542_v0, %v546_v1  ;;  %v1772_v59 = vrot.slane %v1770_v45, 1 }
  0x89   : > { %1558 = vrot.lane.b32.xlu0 %v3417_v15, %s3066_s25  ;;  %v3462_v55 = vpop.permute.xlu0 %1349  ;;  %v713_v15 = vrot.slane %v3299_v49, 1  ;;  %v1143_v49 = vshll.u32 %v3478_v10, 16 }
  0x8a   : > { %v735_v61 = vpop.permute.xlu1 %734  ;;  %v1773_v5 = vor.u32 %v1772_v59, %v1768_v58  ;;  %v1177_v58 = vshrl.u32 %v3583_v35, 16 }
  0x8b   : > { %v715_v24 = vsel %vm685_vm0, %v713_v15, %v714_v17  ;;  %v1145_v30 = vrot.slane %v1143_v49, 1  ;;  %v563_v15 = vshll.u32 %v3371_v38, 16  ;;  %v558_v49 = vrot.slane %v556_v13, 1  ;;  %v3628_v13 = vld [vmem:[%s3113_s19 + $0xa4] ss:$0 sps:$4 sm:$0x11]  }
  0x8c   : > { %1865 = vrot.lane.b32.xlu1 %v1754_v53, %s3067_s26  ;;  %v1325_v53 = vrot.slane %v3478_v10, 1 }
  0x8d   : > { %1863 = vrot.lane.b32.xlu0 %v1742_v60, %s3067_s26  ;;  %v1146_v40 = vor.u32 %v1145_v30, %v1141_v29  ;;  %v1330_v60 = vsel %vm685_vm0, %v1328_v37, %v1329_v48  ;;  %v3008_v37 = vld [vmem:[%s3113_s19 + $0x98] ss:$0 sps:$4 sm:$0x11]   ;;  %v1179_v48 = vshll.u32 %v3583_v35, 16 }
  0x8e   : > { %v737_v3 = vpop.permute.xlu1 %736  ;;  %v1327_v0 = vsel %vm685_vm0, %v1325_v53, %v1326_v54  ;;  %v716_v53 = vrot.slane %v3350_v20, 1  ;;  %v717_v54 = vrot.slane %v3551_v62, 1  ;;  %v1184_v59 = vshll.u32 %v3008_v37, 16 }
  0x8f   : > { %v621_v12 = vpop.permute.xlu0 %620 }
  0x90   : > { %669 = vst.msk [vmem:[#allocation2] sm:$0xff] %vm668_vm4, %v621_v12  ;;  %636 = vrot.lane.b32.xlu1 %v535_v11, %s3064_s23  ;;  %v553_v12 = vrot.slane %v551_v63, 1 }
  0x91   : > { %783 = vst.msk [vmem:[#allocation2] sm:$0xff] %vm782_vm5, %v735_v61  ;;  %1976 = vrot.lane.b32.xlu0 %v1936_v4, %s3068_s27  ;;  %v1775_v61 = vshll.u32 %v3528_v44, 16 }
  0x92   : > { %v1352_v19 = vpop.permute.xlu1 %1351  ;;  %980 = vst.msk [vmem:[#allocation2] sm:$0xff] %vm979_vm6, %v932_v42  ;;  %v3521_v42 = vld [vmem:[%s3113_s19 + $0x78] sm:$0xff]  }
  0x93   : > { %v623_v22 = vpop.permute.xlu0 %622  ;;  %v1758_v56 = vshll.u32 %v3521_v42, 16  ;;  %v1756_v1 = vshrl.u32 %v3521_v42, 16  ;;  %v1777_v6 = vrot.slane %v1775_v61, 1  ;;  %v1940_v26 = vrot.slane %v3521_v42, 1 }
  0x94   : > { %670 = vst.msk [vmem:[#allocation2 + $0x8] sm:$0xff] %vm668_vm4, %v623_v22  ;;  %638 = vrot.lane.b32.xlu1 %v547_v9, %s3064_s23  ;;  %v565_v22 = vrot.slane %v563_v15, 1 }
  0x95   : > { %784 = vst.msk [vmem:[#allocation2 + $0x8] sm:$0xff] %vm782_vm5, %v737_v3  ;;  %1978 = vrot.lane.b32.xlu0 %v1939_v21, %s3068_s27  ;;  %v561_v21 = vshrl.u32 %v3371_v38, 16 }
  0x96   : > { %v1239_v27 = vpop.permute.xlu1 %1238  ;;  %981 = vst.msk [vmem:[#allocation2 + $0x8] sm:$0xff] %vm979_vm6, %v3441_v41  ;;  %v1150_v41 = vrot.slane %v1148_v31, 1 }
  0x97   : > { %1286 = vst.msk [vmem:[#allocation2 + $0x8] sm:$0xff] %vm1284_vm7, %v1239_v27  ;;  %v1237_v33 = vpop.permute.xlu0 %1236  ;;  %v566_v31 = vor.u32 %v565_v22, %v561_v21 }
  0x98   : > { %1285 = vst.msk [vmem:[#allocation2] sm:$0xff] %vm1284_vm7, %v1237_v33  ;;  %752 = vrot.lane.b32.xlu1 %v715_v24, %s3063_s22  ;;  %v1151_v51 = vsel %vm427_vm2, %v1146_v40, %v1150_v41  ;;  %v570_v33 = vrot.slane %v568_v23, 1  ;;  %v1943_v40 = vrot.slane %v3515_v34, 1  ;;  %v1944_v41 = vrot.slane %v3528_v44, 1 }
  0x99   : > { %1399 = vst.msk [vmem:[#allocation2 + $0x8] sm:$0xff] %vm1397_vm8, %v1352_v19  ;;  %750 = vrot.lane.b32.xlu0 %v712_v28, %s3063_s22  ;;  %1398 = vst.msk [vmem:[#allocation2] sm:$0xff] %vm1397_vm8, %v3462_v55  ;;  %v3540_v55 = vld [vmem:[%s3113_s19 + $0x80] ss:$0 sps:$4 sm:$0x11]   ;;  %v1778_v19 = vsel %vm427_vm2, %v1773_v5, %v1777_v6  ;;  %v720_v44 = vrot.slane %v3004_v14, 1 }
  0x9a   : > { %v1549_v39 = vpop.permute.xlu1 %1548  ;;  %v1763_v3 = vshll.u32 %v3540_v55, 16  ;;  %v1941_v27 = vrot.slane %v3540_v55, 1  ;;  %v3007_v55 = vld [vmem:[%s3113_s19 + $0x8c] ss:$0 sps:$4 sm:$0x11]  }
  0x9b   : > { %v1547_v43 = vpop.permute.xlu0 %1546  ;;  %1596 = vst.msk [vmem:[#allocation2 + $0x8] sm:$0xff] %vm1594_vm9, %v1549_v39  ;;  %v1332_v21 = vrot.slane %v3007_v55, 1 }
  0x9c   : > { %1595 = vst.msk [vmem:[#allocation2] sm:$0xff] %vm1594_vm9, %v1547_v43  ;;  %949 = vrot.lane.b32.xlu1 %v3472_v2, %s3061_s20  ;;  %v1760_v2 = vrot.slane %v1758_v56, 1  ;;  %v1765_v16 = vrot.slane %v1763_v3, 1  ;;  %v1942_v39 = vsel %vm685_vm0, %v1940_v26, %v1941_v27  ;;  %v1186_v3 = vrot.slane %v1184_v59, 1 }
  0x9d   : > { %947 = vrot.lane.b32.xlu0 %v3478_v10, %s3061_s20  ;;  %v549_v10 = vshrl.u32 %v3350_v20, 16  ;;  %v1181_v20 = vrot.slane %v1179_v48, 1  ;;  %v3647_v27 = vld [vmem:[%s3113_s19 + $0x98] ss:$0 sps:$4 sm:$0x11]  }
  0x9e   : > { %v1854_v50 = vpop.permute.xlu1 %1853  ;;  %v1761_v9 = vor.u32 %v1760_v2, %v1756_v1  ;;  %v3617_v1 = vld [vmem:[%s3113_s19 + $0x9c] sm:$0xff]  }
  0x9f   : > { %v1852_v57 = vpop.permute.xlu0 %1851  ;;  %1901 = vst.msk [vmem:[#allocation2 + $0x8] sm:$0xff] %vm1899_vm10, %v1854_v50  ;;  %v554_v47 = vor.u32 %v553_v12, %v549_v10  ;;  %v1182_v2 = vor.u32 %v1181_v20, %v1177_v58  ;;  %v3621_v10 = vld [vmem:[%s3113_s19 + $0x90] sm:$0xff]   ;;  %v1794_v14 = vshll.u32 %v3617_v1, 16  ;;  %v1792_v23 = vshrl.u32 %v3617_v1, 16 }
  0xa0   : > { %1900 = vst.msk [vmem:[#allocation2] sm:$0xff] %vm1899_vm10, %v1852_v57  ;;  %1254 = vrot.lane.b32.xlu1 %v1163_v46, %s3065_s24  ;;  %v1766_v25 = vsel %vm427_vm2, %v1761_v9, %v1765_v16  ;;  %v571_v46 = vsel %vm427_vm2, %v566_v31, %v570_v33  ;;  %v1335_v9 = vrot.slane %v3008_v37, 1  ;;  %v1780_v31 = vshrl.u32 %v3621_v10, 16 }
  0xa1   : > { %1252 = vrot.lane.b32.xlu0 %v1151_v51, %s3065_s24  ;;  %v559_v30 = vsel %vm427_vm2, %v554_v47, %v558_v49  ;;  %v1945_v51 = vsel %vm685_vm0, %v1943_v40, %v1944_v41  ;;  %v1187_v15 = vsel %vm427_vm2, %v1182_v2, %v1186_v3  ;;  %v3011_v47 = vld [vmem:[%s3113_s19 + $0x98] ss:$0 sps:$4 sm:$0x11]   ;;  %v1782_v49 = vshll.u32 %v3621_v10, 16 }
  0xa2   : > { %v625_v11 = vpop.permute.xlu1 %624  ;;  %v573_v41 = vshrl.u32 %v3399_v8, 16  ;;  %v1946_v58 = vrot.slane %v3621_v10, 1  ;;  %v1947_v20 = vrot.slane %v3011_v47, 1  ;;  %v1949_v3 = vrot.slane %v3617_v1, 1 }
  0xa3   : > { %v1965_v4 = vpop.permute.xlu0 %1964  ;;  %671 = vst.msk [vmem:[#allocation2 + $0x10] sm:$0xff] %vm668_vm4, %v625_v11  ;;  %v1172_v11 = vshll.u32 %v3007_v55, 16  ;;  %v1784_v33 = vrot.slane %v1782_v49, 1 }
  0xa4   : > { %2013 = vst.msk [vmem:[#allocation2] sm:$0xff] %vm2012_vm11, %v1965_v4  ;;  %1367 = vrot.lane.b32.xlu1 %v1330_v60, %s3062_s21  ;;  %v718_v60 = vsel %vm685_vm0, %v716_v53, %v717_v54  ;;  %v1948_v2 = vsel %vm685_vm0, %v1946_v58, %v1947_v20  ;;  %v599_v58 = vshll.u32 %v3449_v32, 16 }
  0xa5   : > { %1365 = vrot.lane.b32.xlu0 %v1327_v0, %s3062_s21  ;;  %v1174_v6 = vrot.slane %v1172_v11, 1  ;;  %v3677_v11 = vld [vmem:[%s3113_s19 + $0xa8] sm:$0xff]  }
  0xa6   : > { %v627_v17 = vpop.permute.xlu1 %626  ;;  %v1201_v49 = vshrl.u32 %v3677_v11, 16 }
  0xa7   : > { %v1967_v18 = vpop.permute.xlu0 %1966  ;;  %672 = vst.msk [vmem:[#allocation2 + $0x18] sm:$0xff] %vm668_vm4, %v627_v17  ;;  %v1334_v17 = vrot.slane %v3583_v35, 1 }
  0xa8   : > { %2014 = vst.msk [vmem:[#allocation2 + $0x8] sm:$0xff] %vm2012_vm11, %v1967_v18  ;;  %1564 = vrot.lane.b32.xlu1 %v3515_v34, %s3066_s25  ;;  %v719_v34 = vrot.slane %v3371_v38, 1 }
  0xa9   : > { %1562 = vrot.lane.b32.xlu0 %v3521_v42, %s3066_s25  ;;  %v3589_v42 = vld [vmem:[%s3113_s19 + $0x84] sm:$0xff]   ;;  %v1336_v26 = vsel %vm685_vm0, %v1334_v17, %v1335_v9 }
  0xaa   : > { %v741_v24 = vpop.permute.xlu1 %740  ;;  %v1167_v56 = vshll.u32 %v3589_v42, 16  ;;  %v721_v38 = vsel %vm685_vm0, %v719_v34, %v720_v44  ;;  %v1165_v62 = vshrl.u32 %v3589_v42, 16  ;;  %v1785_v44 = vor.u32 %v1784_v33, %v1780_v31 }
  0xab   : > { %v739_v28 = vpop.permute.xlu0 %738  ;;  %786 = vst.msk [vmem:[#allocation2 + $0x18] sm:$0xff] %vm782_vm5, %v741_v24  ;;  %v2029_v29 = vld [vmem:[#allocation2] sm:$0xff]  ;;  %v1796_v24 = vrot.slane %v1794_v14, 1  ;;  %v3020_v14 = vld [vmem:[%s3113_s19 + $0xb0] ss:$0 sps:$4 sm:$0x11]  }
  0xac   : > { %785 = vst.msk [vmem:[#allocation2 + $0x10] sm:$0xff] %vm782_vm5, %v739_v28  ;;  %2865 = vmatprep.mubr.msk.bf16.mxu0 %vm2065_vm12, %v2029_v29  ;;  %1869 = vrot.lane.b32.xlu1 %v1778_v19, %s3067_s26  ;;  %v1169_v63 = vrot.slane %v1167_v56, 1  ;;  %v1331_v19 = vrot.slane %v3589_v42, 1  ;;  %v575_v28 = vshll.u32 %v3399_v8, 16 }
  0xad   : > { %1867 = vrot.lane.b32.xlu0 %v1766_v25, %s3067_s26  ;;  %v1799_v25 = vshll.u32 %v3628_v13, 16 }
  0xae   : > { %v938_v36 = vpop.permute.xlu1 %937  ;;  %v1170_v5 = vor.u32 %v1169_v63, %v1165_v62 }
  0xaf   : > { %v936_v43 = vpop.permute.xlu0 %935  ;;  %983 = vst.msk [vmem:[#allocation2 + $0x18] sm:$0xff] %vm979_vm6, %v938_v36  ;;  %v2030_v45 = vld [vmem:[#allocation2 + $0x8] sm:$0xff]  ;;  %v1801_v40 = vrot.slane %v1799_v25, 1 }
  0xb0   : > { %982 = vst.msk [vmem:[#allocation2 + $0x10] sm:$0xff] %vm979_vm6, %v936_v43  ;;  %2866 = vmatmul.mubr.msk.bf16.vlgmr.msra.gmra.mrb[0].mxu0 %vm2065_vm12, %v2030_v45  ;;  %640 = vrot.lane.b32.xlu1 %v559_v30, %s3064_s23  ;;  %v1175_v18 = vsel %vm427_vm2, %v1170_v5, %v1174_v6  ;;  %v1333_v30 = vsel %vm685_vm0, %v1331_v19, %v1332_v21  ;;  %v580_v43 = vshll.u32 %v3647_v27, 16  ;;  %v3016_v45 = vld [vmem:[%s3113_s19 + $0xa4] ss:$0 sps:$4 sm:$0x11]   ;;  %v3683_v5 = vld [vmem:[%s3113_s19 + $0x9c] sm:$0xff]  }
  0xb1   : > { %1980 = vrot.lane.b32.xlu0 %v1942_v39, %s3068_s27  ;;  %v1797_v39 = vor.u32 %v1796_v24, %v1792_v23  ;;  %v592_v56 = vshll.u32 %v3016_v45, 16  ;;  %v3019_v19 = vld [vmem:[%s3113_s19 + $0xa4] ss:$0 sps:$4 sm:$0x11]   ;;  %v1191_v21 = vshll.u32 %v3683_v5, 16  ;;  %v1189_v25 = vshrl.u32 %v3683_v5, 16 }
  0xb2   : > { %v1243_v50 = vpop.permute.xlu1 %1242  ;;  %v582_v54 = vrot.slane %v580_v43, 1 }
  0xb3   : > { %v1241_v57 = vpop.permute.xlu0 %1240  ;;  %1288 = vst.msk [vmem:[#allocation2 + $0x18] sm:$0xff] %vm1284_vm7, %v1243_v50  ;;  %v1802_v50 = vsel %vm427_vm2, %v1797_v39, %v1801_v40  ;;  %v594_v63 = vrot.slane %v592_v56, 1  ;;  %v3715_v39 = vld [vmem:[%s3113_s19 + $0xa8] sm:$0xff]  }
  0xb4   : > { %1287 = vst.msk [vmem:[#allocation2 + $0x10] sm:$0xff] %vm1284_vm7, %v1241_v57  ;;  %642 = vrot.lane.b32.xlu1 %v571_v46, %s3064_s23  ;;  %v587_v46 = vshll.u32 %v3407_v7, 16 }
  0xb5   : > { %1982 = vrot.lane.b32.xlu0 %v1945_v51, %s3068_s27  ;;  %v585_v51 = vshrl.u32 %v3407_v7, 16 }
  0xb6   : > { %v1356_v61 = vpop.permute.xlu1 %1355  ;;  %v589_v55 = vrot.slane %v587_v46, 1  ;;  %v1341_v46 = vrot.slane %v3020_v14, 1 }
  0xb7   : > { %v1354_v0 = vpop.permute.xlu0 %1353  ;;  %1401 = vst.msk [vmem:[#allocation2 + $0x18] sm:$0xff] %vm1397_vm8, %v1356_v61 }
  0xb8   : > { %1400 = vst.msk [vmem:[#allocation2 + $0x10] sm:$0xff] %vm1397_vm8, %v1354_v0  ;;  %756 = vrot.lane.b32.xlu1 %v721_v38, %s3063_s22  ;;  %v590_v62 = vor.u32 %v589_v55, %v585_v51  ;;  %v1806_v51 = vshll.u32 %v3715_v39, 16 }
  0xb9   : > { %754 = vrot.lane.b32.xlu0 %v718_v60, %s3063_s22 }
  0xba   : > { %v1553_v4 = vpop.permute.xlu1 %1552 }
  0xbb   : > { %v1551_v12 = vpop.permute.xlu0 %1550  ;;  %1598 = vst.msk [vmem:[#allocation2 + $0x18] sm:$0xff] %vm1594_vm9, %v1553_v4  ;;  %v1950_v4 = vrot.slane %v3628_v13, 1  ;;  %v726_v13 = vrot.slane %v3016_v45, 1  ;;  %v1340_v45 = vrot.slane %v3677_v11, 1 }
  0xbc   : > { %1597 = vst.msk [vmem:[#allocation2 + $0x10] sm:$0xff] %vm1594_vm9, %v1551_v12  ;;  %953 = vrot.lane.b32.xlu1 %v3583_v35, %s3061_s20  ;;  %v1787_v35 = vshll.u32 %v3011_v47, 16  ;;  %v595_v12 = vsel %vm427_vm2, %v590_v62, %v594_v63 }
  0xbd   : > { %951 = vrot.lane.b32.xlu0 %v3589_v42, %s3061_s20  ;;  %v577_v42 = vrot.slane %v575_v28, 1  ;;  %v1951_v9 = vsel %vm685_vm0, %v1949_v3, %v1950_v4  ;;  %v601_v3 = vrot.slane %v599_v58, 1 }
  0xbe   : > { %v1858_v16 = vpop.permute.xlu1 %1857  ;;  %v1789_v37 = vrot.slane %v1787_v35, 1 }
  0xbf   : > { %v1856_v22 = vpop.permute.xlu0 %1855  ;;  %1903 = vst.msk [vmem:[#allocation2 + $0x18] sm:$0xff] %vm1899_vm10, %v1858_v16  ;;  %v578_v53 = vor.u32 %v577_v42, %v573_v41  ;;  %v722_v16 = vrot.slane %v3399_v8, 1  ;;  %v3722_v41 = vld [vmem:[%s3113_s19 + $0xbc] ss:$0 sps:$4 sm:$0x11]  }
  0xc0   : > { %1902 = vst.msk [vmem:[#allocation2 + $0x10] sm:$0xff] %vm1899_vm10, %v1856_v22  ;;  %1258 = vrot.lane.b32.xlu1 %v1187_v15, %s3065_s24  ;;  %v1790_v38 = vsel %vm427_vm2, %v1785_v44, %v1789_v37  ;;  %v1203_v15 = vshll.u32 %v3677_v11, 16  ;;  %v1208_v22 = vshll.u32 %v3020_v14, 16  ;;  %v1337_v37 = vrot.slane %v3683_v5, 1 }
  0xc1   : > { %1256 = vrot.lane.b32.xlu0 %v1175_v18, %s3065_s24  ;;  %v583_v60 = vsel %vm427_vm2, %v578_v53, %v582_v54  ;;  %v723_v18 = vrot.slane %v3647_v27, 1  ;;  %v1196_v27 = vshll.u32 %v3019_v19, 16  ;;  %v1823_v56 = vshll.u32 %v3722_v41, 16 }
  0xc2   : > { %v629_v29 = vpop.permute.xlu1 %628  ;;  %v1205_v8 = vrot.slane %v1203_v15, 1  ;;  %v1210_v31 = vrot.slane %v1208_v22, 1  ;;  %v609_v15 = vshrl.u32 %v3454_v52, 16 }
  0xc3   : > { %v1969_v36 = vpop.permute.xlu0 %1968  ;;  %673 = vst.msk [vmem:[#allocation2 + $0x20] sm:$0xff] %vm668_vm4, %v629_v29  ;;  %v724_v24 = vsel %vm685_vm0, %v722_v16, %v723_v18  ;;  %v3711_v29 = vld [vmem:[%s3113_s19 + $0xb4] sm:$0xff]  }
  0xc4   : > { %2015 = vst.msk [vmem:[#allocation2 + $0x10] sm:$0xff] %vm2012_vm11, %v1969_v36  ;;  %1371 = vrot.lane.b32.xlu1 %v1336_v26, %s3062_s21  ;;  %v1193_v26 = vrot.slane %v1191_v21, 1  ;;  %v1198_v36 = vrot.slane %v1196_v27, 1  ;;  %v1818_v42 = vshll.u32 %v3711_v29, 16  ;;  %v1816_v54 = vshrl.u32 %v3711_v29, 16 }
  0xc5   : > { %1369 = vrot.lane.b32.xlu0 %v1333_v30, %s3062_s21  ;;  %v1206_v30 = vor.u32 %v1205_v8, %v1201_v49 }
  0xc6   : > { %v631_v34 = vpop.permute.xlu1 %630  ;;  %v1194_v35 = vor.u32 %v1193_v26, %v1189_v25  ;;  %v1820_v55 = vrot.slane %v1818_v42, 1  ;;  %v3771_v25 = vld [vmem:[%s3113_s19 + $0xc0] sm:$0xff]  }
  0xc7   : > { %v1971_v48 = vpop.permute.xlu0 %1970  ;;  %674 = vst.msk [vmem:[#allocation2 + $0x28] sm:$0xff] %vm668_vm4, %v631_v34  ;;  %v1211_v43 = vsel %vm427_vm2, %v1206_v30, %v1210_v31  ;;  %v1956_v30 = vrot.slane %v3722_v41, 1  ;;  %v3777_v31 = vld [vmem:[%s3113_s19 + $0xb4] sm:$0xff]   ;;  %v1227_v41 = vshll.u32 %v3771_v25, 16 }
  0xc8   : > { %2016 = vst.msk [vmem:[#allocation2 + $0x18] sm:$0xff] %vm2012_vm11, %v1971_v48  ;;  %1568 = vrot.lane.b32.xlu1 %v3617_v1, %s3066_s25  ;;  %v725_v1 = vrot.slane %v3407_v7, 1  ;;  %v1199_v44 = vsel %vm427_vm2, %v1194_v35, %v1198_v36  ;;  %v1338_v48 = vrot.slane %v3019_v19, 1 }
  0xc9   : > { %1566 = vrot.lane.b32.xlu0 %v3621_v10, %s3066_s25 }
  0xca   : > { %v745_v57 = vpop.permute.xlu1 %744  ;;  %v727_v7 = vsel %vm685_vm0, %v725_v1, %v726_v13 }
  0xcb   : > { %v743_v59 = vpop.permute.xlu0 %742  ;;  %788 = vst.msk [vmem:[#allocation2 + $0x28] sm:$0xff] %vm782_vm5, %v745_v57  ;;  %v2031_v61 = vld [vmem:[#allocation2 + $0x10] sm:$0xff]  ;;  %v1342_v57 = vsel %vm685_vm0, %v1340_v45, %v1341_v46  ;;  %v728_v45 = vrot.slane %v3449_v32, 1 }
  0xcc   : > { %787 = vst.msk [vmem:[#allocation2 + $0x20] sm:$0xff] %vm782_vm5, %v743_v59  ;;  %2869 = vmatprep.mubr.msk.bf16.mxu0 %vm2065_vm12, %v2031_v61  ;;  %1873 = vrot.lane.b32.xlu1 %v1802_v50, %s3067_s26  ;;  %v3023_v50 = vld [vmem:[%s3113_s19 + $0xb0] ss:$0 sps:$4 sm:$0x11]   ;;  %v1339_v59 = vsel %vm685_vm0, %v1337_v37, %v1338_v48  ;;  %v1804_v61 = vshrl.u32 %v3715_v39, 16  ;;  %v1225_v48 = vshrl.u32 %v3771_v25, 16 }
  0xcd   : > { %1871 = vrot.lane.b32.xlu0 %v1790_v38, %s3067_s26  ;;  %v3741_v38 = vld [vmem:[%s3113_s19 + $0xb0] ss:$0 sps:$4 sm:$0x11]   ;;  %v1811_v62 = vshll.u32 %v3023_v50, 16 }
  0xce   : > { %v942_v0 = vpop.permute.xlu1 %941  ;;  %v604_v4 = vshll.u32 %v3741_v38, 16  ;;  %v729_v46 = vrot.slane %v3741_v38, 1 }
  0xcf   : > { %v940_v6 = vpop.permute.xlu0 %939  ;;  %985 = vst.msk [vmem:[#allocation2 + $0x28] sm:$0xff] %vm979_vm6, %v942_v0  ;;  %v2032_v10 = vld [vmem:[#allocation2 + $0x18] sm:$0xff]  ;;  %v1825_v0 = vrot.slane %v1823_v56, 1  ;;  %v1813_v1 = vrot.slane %v1811_v62, 1  ;;  %v3809_v62 = vld [vmem:[%s3113_s19 + $0xc0] sm:$0xff]  }
  0xd0   : > { %984 = vst.msk [vmem:[#allocation2 + $0x20] sm:$0xff] %vm979_vm6, %v940_v6  ;;  %2870 = vmatmul.mubr.msk.bf16.gmra.mrb[4].mxu0 %vm2065_vm12, %v2032_v10  ;;  %644 = vrot.lane.b32.xlu1 %v583_v60, %s3064_s23  ;;  %v1808_v60 = vrot.slane %v1806_v51, 1  ;;  %v611_v6 = vshll.u32 %v3454_v52, 16 }
  0xd1   : > { %1984 = vrot.lane.b32.xlu0 %v1948_v2, %s3068_s27  ;;  %v597_v2 = vshrl.u32 %v3449_v32, 16  ;;  %v1229_v32 = vrot.slane %v1227_v41, 1 }
  0xd2   : > { %v1247_v17 = vpop.permute.xlu1 %1246  ;;  %v613_v16 = vrot.slane %v611_v6, 1 }
  0xd3   : > { %v1245_v47 = vpop.permute.xlu0 %1244  ;;  %1290 = vst.msk [vmem:[#allocation2 + $0x28] sm:$0xff] %vm1284_vm7, %v1247_v17  ;;  %v602_v17 = vor.u32 %v601_v3, %v597_v2  ;;  %v1230_v38 = vor.u32 %v1229_v32, %v1225_v48  ;;  %v3036_v3 = vld [vmem:[%s3113_s19 + $0xd4] ss:$0 sps:$4 sm:$0x11]  }
  0xd4   : > { %1289 = vst.msk [vmem:[#allocation2 + $0x20] sm:$0xff] %vm1284_vm7, %v1245_v47  ;;  %646 = vrot.lane.b32.xlu1 %v595_v12, %s3064_s23  ;;  %v1809_v12 = vor.u32 %v1808_v60, %v1804_v61  ;;  %v1952_v47 = vrot.slane %v3715_v39, 1 }
  0xd5   : > { %1986 = vrot.lane.b32.xlu0 %v1951_v9, %s3068_s27  ;;  %v606_v9 = vrot.slane %v604_v4, 1 }
  0xd6   : > { %v1360_v23 = vpop.permute.xlu1 %1359  ;;  %v1814_v21 = vsel %vm427_vm2, %v1809_v12, %v1813_v1  ;;  %v3035_v1 = vld [vmem:[%s3113_s19 + $0xc8] ss:$0 sps:$4 sm:$0x11]  }
  0xd7   : > { %v1358_v28 = vpop.permute.xlu0 %1357  ;;  %1403 = vst.msk [vmem:[#allocation2 + $0x28] sm:$0xff] %vm1397_vm8, %v1360_v23  ;;  %v607_v22 = vsel %vm427_vm2, %v602_v17, %v606_v9  ;;  %v614_v23 = vor.u32 %v613_v16, %v609_v15  ;;  %v1847_v16 = vshll.u32 %v3036_v3, 16 }
  0xd8   : > { %1402 = vst.msk [vmem:[#allocation2 + $0x20] sm:$0xff] %vm1397_vm8, %v1358_v28  ;;  %760 = vrot.lane.b32.xlu1 %v727_v7, %s3063_s22  ;;  %v1953_v7 = vrot.slane %v3023_v50, 1  ;;  %v1955_v28 = vrot.slane %v3711_v29, 1 }
  0xd9   : > { %758 = vrot.lane.b32.xlu0 %v724_v24, %s3063_s22 }
  0xda   : > { %v1557_v33 = vpop.permute.xlu1 %1556  ;;  %v1954_v27 = vsel %vm685_vm0, %v1952_v47, %v1953_v7  ;;  %v1835_v7 = vshll.u32 %v3035_v1, 16 }
  0xdb   : > { %v1555_v40 = vpop.permute.xlu0 %1554  ;;  %1600 = vst.msk [vmem:[#allocation2 + $0x28] sm:$0xff] %vm1594_vm9, %v1557_v33 }
  0xdc   : > { %1599 = vst.msk [vmem:[#allocation2 + $0x20] sm:$0xff] %vm1594_vm9, %v1555_v40  ;;  %957 = vrot.lane.b32.xlu1 %v3677_v11, %s3061_s20  ;;  %v1821_v11 = vor.u32 %v1820_v55, %v1816_v54  ;;  %v3032_v40 = vld [vmem:[%s3113_s19 + $0xc8] ss:$0 sps:$4 sm:$0x11]   ;;  %v1213_v54 = vshrl.u32 %v3777_v31, 16 }
  0xdd   : > { %955 = vrot.lane.b32.xlu0 %v3683_v5, %s3061_s20  ;;  %v3028_v5 = vld [vmem:[%s3113_s19 + $0xbc] ss:$0 sps:$4 sm:$0x11]   ;;  %v1232_v50 = vshll.u32 %v3032_v40, 16  ;;  %v1347_v2 = vrot.slane %v3032_v40, 1 }
  0xde   : > { %v1862_v34 = vpop.permute.xlu1 %1861  ;;  %v1826_v14 = vsel %vm427_vm2, %v1821_v11, %v1825_v0  ;;  %v616_v18 = vshll.u32 %v3028_v5, 16  ;;  %v1346_v0 = vrot.slane %v3771_v25, 1 }
  0xdf   : > { %v1860_v53 = vpop.permute.xlu0 %1859  ;;  %1905 = vst.msk [vmem:[#allocation2 + $0x28] sm:$0xff] %vm1899_vm10, %v1862_v34  ;;  %v3031_v34 = vld [vmem:[%s3113_s19 + $0xbc] ss:$0 sps:$4 sm:$0x11]   ;;  %v1234_v58 = vrot.slane %v1232_v50, 1 }
  0xe0   : > { %1904 = vst.msk [vmem:[#allocation2 + $0x20] sm:$0xff] %vm1899_vm10, %v1860_v53  ;;  %1262 = vrot.lane.b32.xlu1 %v1211_v43, %s3065_s24  ;;  %v618_v24 = vrot.slane %v616_v18, 1  ;;  %v1957_v43 = vsel %vm685_vm0, %v1955_v28, %v1956_v30  ;;  %v730_v53 = vsel %vm685_vm0, %v728_v45, %v729_v46  ;;  %v1220_v56 = vshll.u32 %v3031_v34, 16 }
  0xe1   : > { %1260 = vrot.lane.b32.xlu0 %v1199_v44, %s3065_s24  ;;  %v1215_v44 = vshll.u32 %v3777_v31, 16  ;;  %v1235_v11 = vsel %vm427_vm2, %v1230_v38, %v1234_v58  ;;  %v1344_v12 = vrot.slane %v3031_v34, 1  ;;  %v1348_v15 = vsel %vm685_vm0, %v1346_v0, %v1347_v2 }
  0xe2   : > { %v633_v20 = vpop.permute.xlu1 %632  ;;  %v619_v36 = vsel %vm427_vm2, %v614_v23, %v618_v24  ;;  %v1222_v60 = vrot.slane %v1220_v56, 1  ;;  %v1962_v30 = vrot.slane %v3036_v3, 1 }
  0xe3   : > { %v1973_v63 = vpop.permute.xlu0 %1972  ;;  %675 = vst.msk [vmem:[#allocation2 + $0x30] sm:$0xff] %vm668_vm4, %v633_v20  ;;  %v1217_v55 = vrot.slane %v1215_v44, 1  ;;  %v3806_v20 = vld [vmem:[%s3113_s19 + $0xcc] sm:$0xff]  }
  0xe4   : > { %2017 = vst.msk [vmem:[#allocation2 + $0x20] sm:$0xff] %vm2012_vm11, %v1973_v63  ;;  %1375 = vrot.lane.b32.xlu1 %v1342_v57, %s3062_s21  ;;  %v1842_v4 = vshll.u32 %v3806_v20, 16  ;;  %v1840_v17 = vshrl.u32 %v3806_v20, 16  ;;  %v1961_v28 = vrot.slane %v3806_v20, 1 }
  0xe5   : > { %1373 = vrot.lane.b32.xlu0 %v1339_v59, %s3062_s21  ;;  %v1218_v61 = vor.u32 %v1217_v55, %v1213_v54 }
  0xe6   : > { %v635_v10 = vpop.permute.xlu1 %634  ;;  %v1844_v9 = vrot.slane %v1842_v4, 1  ;;  %v1963_v40 = vsel %vm685_vm0, %v1961_v28, %v1962_v30 }
  0xe7   : > { %v1975_v13 = vpop.permute.xlu0 %1974  ;;  %676 = vst.msk [vmem:[#allocation2 + $0x38] sm:$0xff] %vm668_vm4, %v635_v10  ;;  %v1223_v6 = vsel %vm427_vm2, %v1218_v61, %v1222_v60  ;;  %v1343_v10 = vrot.slane %v3777_v31, 1 }
  0xe8   : > { %2018 = vst.msk [vmem:[#allocation2 + $0x28] sm:$0xff] %vm2012_vm11, %v1975_v13  ;;  %1572 = vrot.lane.b32.xlu1 %v3711_v29, %s3066_s25  ;;  %v731_v29 = vrot.slane %v3454_v52, 1  ;;  %v1830_v13 = vshll.u32 %v3809_v62, 16 }
  0xe9   : > { %1570 = vrot.lane.b32.xlu0 %v3715_v39, %s3066_s25  ;;  %v732_v39 = vrot.slane %v3028_v5, 1 }
  0xea   : > { %v749_v19 = vpop.permute.xlu1 %748  ;;  %v1832_v47 = vrot.slane %v1830_v13, 1 }
  0xeb   : > { %v747_v49 = vpop.permute.xlu0 %746  ;;  %790 = vst.msk [vmem:[#allocation2 + $0x38] sm:$0xff] %vm782_vm5, %v749_v19  ;;  %v2033_v8 = vld [vmem:[#allocation2 + $0x20] sm:$0xff]  ;;  %v733_v52 = vsel %vm685_vm0, %v731_v29, %v732_v39  ;;  %v1345_v19 = vsel %vm685_vm0, %v1343_v10, %v1344_v12 }
  0xec   : > { %789 = vst.msk [vmem:[#allocation2 + $0x30] sm:$0xff] %vm782_vm5, %v747_v49  ;;  %2873 = vmatprep.mubr.msk.bf16.mxu0 %vm2065_vm12, %v2033_v8  ;;  %1877 = vrot.lane.b32.xlu1 %v1826_v14, %s3067_s26  ;;  %v1845_v8 = vor.u32 %v1844_v9, %v1840_v17 }
  0xed   : > { %1875 = vrot.lane.b32.xlu0 %v1814_v21, %s3067_s26  ;;  %v1828_v21 = vshrl.u32 %v3809_v62, 16 }
  0xee   : > { %v946_v26 = vpop.permute.xlu1 %945 }
  0xef   : > { %v944_v33 = vpop.permute.xlu0 %943  ;;  %987 = vst.msk [vmem:[#allocation2 + $0x38] sm:$0xff] %vm979_vm6, %v946_v26  ;;  %v2034_v35 = vld [vmem:[#allocation2 + $0x28] sm:$0xff]  ;;  %v1833_v24 = vor.u32 %v1832_v47, %v1828_v21 }
  0xf0   : > { %986 = vst.msk [vmem:[#allocation2 + $0x30] sm:$0xff] %vm979_vm6, %v944_v33  ;;  %2874 = vmatmul.mubr.msk.bf16.gmra.mrb[8].mxu0 %vm2065_vm12, %v2034_v35  ;;  %648 = vrot.lane.b32.xlu1 %v607_v22, %s3064_s23  ;;  %v1849_v22 = vrot.slane %v1847_v16, 1  ;;  %v1958_v35 = vrot.slane %v3809_v62, 1 }
  0xf1   : > { %1988 = vrot.lane.b32.xlu0 %v1954_v27, %s3068_s27 }
  0xf2   : > { %v1251_v42 = vpop.permute.xlu1 %1250  ;;  %v1850_v27 = vsel %vm427_vm2, %v1845_v8, %v1849_v22 }
  0xf3   : > { %v1249_v37 = vpop.permute.xlu0 %1248  ;;  %1292 = vst.msk [vmem:[#allocation2 + $0x38] sm:$0xff] %vm1284_vm7, %v1251_v42 }
  0xf4   : > { %1291 = vst.msk [vmem:[#allocation2 + $0x30] sm:$0xff] %vm1284_vm7, %v1249_v37  ;;  %650 = vrot.lane.b32.xlu1 %v619_v36, %s3064_s23  ;;  %v1959_v36 = vrot.slane %v3035_v1, 1 }
  0xf5   : > { %1990 = vrot.lane.b32.xlu0 %v1957_v43, %s3068_s27 }
  0xf6   : > { %v1364_v51 = vpop.permute.xlu1 %1363  ;;  %v1960_v42 = vsel %vm685_vm0, %v1958_v35, %v1959_v36 }
  0xf7   : > { %v1362_v57 = vpop.permute.xlu0 %1361  ;;  %1405 = vst.msk [vmem:[#allocation2 + $0x38] sm:$0xff] %vm1397_vm8, %v1364_v51 }
  0xf8   : > { %1404 = vst.msk [vmem:[#allocation2 + $0x30] sm:$0xff] %vm1397_vm8, %v1362_v57  ;;  %764 = vrot.lane.b32.xlu1 %v733_v52, %s3063_s22 }
  0xf9   : > { %762 = vrot.lane.b32.xlu0 %v730_v53, %s3063_s22 }
  0xfa   : > { %v1561_v59 = vpop.permute.xlu1 %1560 }
  0xfb   : > { %v1559_v63 = vpop.permute.xlu0 %1558  ;;  %1602 = vst.msk [vmem:[#allocation2 + $0x38] sm:$0xff] %vm1594_vm9, %v1561_v59 }
  0xfc   : > { %1601 = vst.msk [vmem:[#allocation2 + $0x30] sm:$0xff] %vm1594_vm9, %v1559_v63  ;;  %961 = vrot.lane.b32.xlu1 %v3771_v25, %s3061_s20  ;;  %v1837_v25 = vrot.slane %v1835_v7, 1 }
  0xfd   : > { %959 = vrot.lane.b32.xlu0 %v3777_v31, %s3061_s20 }
  0xfe   : > { %v1866_v5 = vpop.permute.xlu1 %1865  ;;  %v1838_v33 = vsel %vm427_vm2, %v1833_v24, %v1837_v25 }
  0xff   : > { %v1864_v14 = vpop.permute.xlu0 %1863  ;;  %1907 = vst.msk [vmem:[#allocation2 + $0x38] sm:$0xff] %vm1899_vm10, %v1866_v5 }
 0x100   : > { %1906 = vst.msk [vmem:[#allocation2 + $0x30] sm:$0xff] %vm1899_vm10, %v1864_v14  ;;  %1266 = vrot.lane.b32.xlu1 %v1235_v11, %s3065_s24 }
 0x101   : > { %1264 = vrot.lane.b32.xlu0 %v1223_v6, %s3065_s24 }
 0x102   : > { %v637_v18 = vpop.permute.xlu1 %636 }
 0x103   : > { %v1977_v49 = vpop.permute.xlu0 %1976  ;;  %677 = vst.msk [vmem:[#allocation2 + $0x40] sm:$0xff] %vm668_vm4, %v637_v18 }
 0x104   : > { %2019 = vst.msk [vmem:[#allocation2 + $0x30] sm:$0xff] %vm2012_vm11, %v1977_v49  ;;  %1379 = vrot.lane.b32.xlu1 %v1348_v15, %s3062_s21 }
 0x105   : > { %1377 = vrot.lane.b32.xlu0 %v1345_v19, %s3062_s21 }
 0x106   : > { %v639_v23 = vpop.permute.xlu1 %638 }
 0x107   : > { %v1979_v26 = vpop.permute.xlu0 %1978  ;;  %678 = vst.msk [vmem:[#allocation2 + $0x48] sm:$0xff] %vm668_vm4, %v639_v23 }
 0x108   : > { %2020 = vst.msk [vmem:[#allocation2 + $0x38] sm:$0xff] %vm2012_vm11, %v1979_v26  ;;  %1576 = vrot.lane.b32.xlu1 %v3806_v20, %s3066_s25 }
 0x109   : > { %1574 = vrot.lane.b32.xlu0 %v3809_v62, %s3066_s25 }
 0x10a   : > { %v753_v31 = vpop.permute.xlu1 %752 }
 0x10b   : > { %v751_v29 = vpop.permute.xlu0 %750  ;;  %792 = vst.msk [vmem:[#allocation2 + $0x48] sm:$0xff] %vm782_vm5, %v753_v31  ;;  %v2035_v39 = vld [vmem:[#allocation2 + $0x30] sm:$0xff] }
 0x10c   : > { %791 = vst.msk [vmem:[#allocation2 + $0x40] sm:$0xff] %vm782_vm5, %v751_v29  ;;  %2877 = vmatprep.mubr.msk.bf16.mxu0 %vm2065_vm12, %v2035_v39  ;;  %1881 = vrot.lane.b32.xlu1 %v1850_v27, %s3067_s26 }
 0x10d   : > { %1879 = vrot.lane.b32.xlu0 %v1838_v33, %s3067_s26 }
 0x10e   : > { %v950_v41 = vpop.permute.xlu1 %949 }
 0x10f   : > { %v948_v43 = vpop.permute.xlu0 %947  ;;  %989 = vst.msk [vmem:[#allocation2 + $0x48] sm:$0xff] %vm979_vm6, %v950_v41  ;;  %v2036_v45 = vld [vmem:[#allocation2 + $0x38] sm:$0xff] }
 0x110   : > { %988 = vst.msk [vmem:[#allocation2 + $0x40] sm:$0xff] %vm979_vm6, %v948_v43  ;;  %2878 = vmatmul.mubr.msk.bf16.gmra.mrb[12].mxu0 %vm2065_vm12, %v2036_v45  ;;  %1994 = vrot.lane.b32.xlu1 %v1963_v40, %s3068_s27 }
 0x111   : > { %1992 = vrot.lane.b32.xlu0 %v1960_v42, %s3068_s27 }
 0x112   : > { %v1255_v46 = vpop.permute.xlu1 %1254 }
 0x113   : > { %v1253_v34 = vpop.permute.xlu0 %1252  ;;  %1294 = vst.msk [vmem:[#allocation2 + $0x48] sm:$0xff] %vm1284_vm7, %v1255_v46 }
 0x114   : > { %1293 = vst.msk [vmem:[#allocation2 + $0x40] sm:$0xff] %vm1284_vm7, %v1253_v34 }
 0x116   : > { %v1368_v44 = vpop.permute.xlu1 %1367 }
 0x117   : > { %v1366_v37 = vpop.permute.xlu0 %1365  ;;  %1407 = vst.msk [vmem:[#allocation2 + $0x48] sm:$0xff] %vm1397_vm8, %v1368_v44 }
 0x118   : > { %1406 = vst.msk [vmem:[#allocation2 + $0x40] sm:$0xff] %vm1397_vm8, %v1366_v37 }
 0x11a   : > { %v1565_v52 = vpop.permute.xlu1 %1564 }
 0x11b   : > { %v1563_v48 = vpop.permute.xlu0 %1562  ;;  %1604 = vst.msk [vmem:[#allocation2 + $0x48] sm:$0xff] %vm1594_vm9, %v1565_v52 }
 0x11c   : > { %1603 = vst.msk [vmem:[#allocation2 + $0x40] sm:$0xff] %vm1594_vm9, %v1563_v48 }
 0x11e   : > { %v1870_v32 = vpop.permute.xlu1 %1869 }
 0x11f   : > { %v1868_v50 = vpop.permute.xlu0 %1867  ;;  %1909 = vst.msk [vmem:[#allocation2 + $0x48] sm:$0xff] %vm1899_vm10, %v1870_v32 }
 0x120   : > { %1908 = vst.msk [vmem:[#allocation2 + $0x40] sm:$0xff] %vm1899_vm10, %v1868_v50 }
 0x122   : > { %v641_v51 = vpop.permute.xlu1 %640 }
 0x123   : > { %v1981_v53 = vpop.permute.xlu0 %1980  ;;  %679 = vst.msk [vmem:[#allocation2 + $0x50] sm:$0xff] %vm668_vm4, %v641_v51 }
 0x124   : > { %2021 = vst.msk [vmem:[#allocation2 + $0x40] sm:$0xff] %vm2012_vm11, %v1981_v53 }
 0x126   : > { %v643_v54 = vpop.permute.xlu1 %642 }
 0x127   : > { %v1983_v55 = vpop.permute.xlu0 %1982  ;;  %680 = vst.msk [vmem:[#allocation2 + $0x58] sm:$0xff] %vm668_vm4, %v643_v54 }
 0x128   : > { %2022 = vst.msk [vmem:[#allocation2 + $0x48] sm:$0xff] %vm2012_vm11, %v1983_v55 }
 0x12a   : > { %v757_v56 = vpop.permute.xlu1 %756 }
 0x12b   : > { %v755_v57 = vpop.permute.xlu0 %754  ;;  %794 = vst.msk [vmem:[#allocation2 + $0x58] sm:$0xff] %vm782_vm5, %v757_v56  ;;  %v2037_v38 = vld [vmem:[#allocation2 + $0x40] sm:$0xff] }
 0x12c   : > { %793 = vst.msk [vmem:[#allocation2 + $0x50] sm:$0xff] %vm782_vm5, %v755_v57  ;;  %2881 = vmatprep.mubr.msk.bf16.mxu1 %vm2065_vm12, %v2037_v38 }
 0x12e   : > { %v954_v58 = vpop.permute.xlu1 %953 }
 0x12f   : > { %v952_v20 = vpop.permute.xlu0 %951  ;;  %991 = vst.msk [vmem:[#allocation2 + $0x58] sm:$0xff] %vm979_vm6, %v954_v58  ;;  %v2038_v59 = vld [vmem:[#allocation2 + $0x48] sm:$0xff] }
 0x130   : > { %990 = vst.msk [vmem:[#allocation2 + $0x50] sm:$0xff] %vm979_vm6, %v952_v20  ;;  %2882 = vmatmul.mubr.msk.bf16.vlgmr.msra.gmra.mrb[0].mxu1 %vm2065_vm12, %v2038_v59 }
 0x132   : > { %v1259_v61 = vpop.permute.xlu1 %1258 }
 0x133   : > { %v1257_v60 = vpop.permute.xlu0 %1256  ;;  %1296 = vst.msk [vmem:[#allocation2 + $0x58] sm:$0xff] %vm1284_vm7, %v1259_v61 }
 0x134   : > { %1295 = vst.msk [vmem:[#allocation2 + $0x50] sm:$0xff] %vm1284_vm7, %v1257_v60 }
 0x136   : > { %v1372_v62 = vpop.permute.xlu1 %1371 }
 0x137   : > { %v1370_v63 = vpop.permute.xlu0 %1369  ;;  %1409 = vst.msk [vmem:[#allocation2 + $0x58] sm:$0xff] %vm1397_vm8, %v1372_v62 }
 0x138   : > { %1408 = vst.msk [vmem:[#allocation2 + $0x50] sm:$0xff] %vm1397_vm8, %v1370_v63 }
 0x13a   : > { %v1569_v11 = vpop.permute.xlu1 %1568 }
 0x13b   : > { %v1567_v0 = vpop.permute.xlu0 %1566  ;;  %1606 = vst.msk [vmem:[#allocation2 + $0x58] sm:$0xff] %vm1594_vm9, %v1569_v11 }
 0x13c   : > { %1605 = vst.msk [vmem:[#allocation2 + $0x50] sm:$0xff] %vm1594_vm9, %v1567_v0 }
 0x13e   : > { %v1874_v2 = vpop.permute.xlu1 %1873 }
 0x13f   : > { %v1872_v3 = vpop.permute.xlu0 %1871  ;;  %1911 = vst.msk [vmem:[#allocation2 + $0x58] sm:$0xff] %vm1899_vm10, %v1874_v2 }
 0x140   : > { %1910 = vst.msk [vmem:[#allocation2 + $0x50] sm:$0xff] %vm1899_vm10, %v1872_v3 }
 0x142   : > { %v645_v4 = vpop.permute.xlu1 %644 }
 0x143   : > { %v1985_v5 = vpop.permute.xlu0 %1984  ;;  %681 = vst.msk [vmem:[#allocation2 + $0x60] sm:$0xff] %vm668_vm4, %v645_v4 }
 0x144   : > { %2023 = vst.msk [vmem:[#allocation2 + $0x50] sm:$0xff] %vm2012_vm11, %v1985_v5 }
 0x146   : > { %v647_v6 = vpop.permute.xlu1 %646 }
 0x147   : > { %v1987_v10 = vpop.permute.xlu0 %1986  ;;  %682 = vst.msk [vmem:[#allocation2 + $0x68] sm:$0xff] %vm668_vm4, %v647_v6 }
 0x148   : > { %2024 = vst.msk [vmem:[#allocation2 + $0x58] sm:$0xff] %vm2012_vm11, %v1987_v10 }
 0x14a   : > { %v761_v12 = vpop.permute.xlu1 %760 }
 0x14b   : > { %v759_v1 = vpop.permute.xlu0 %758  ;;  %796 = vst.msk [vmem:[#allocation2 + $0x68] sm:$0xff] %vm782_vm5, %v761_v12  ;;  %v2039_v13 = vld [vmem:[#allocation2 + $0x50] sm:$0xff] }
 0x14c   : > { %795 = vst.msk [vmem:[#allocation2 + $0x60] sm:$0xff] %vm782_vm5, %v759_v1  ;;  %2885 = vmatprep.mubr.msk.bf16.mxu1 %vm2065_vm12, %v2039_v13 }
 0x14e   : > { %v958_v14 = vpop.permute.xlu1 %957 }
 0x14f   : > { %v956_v15 = vpop.permute.xlu0 %955  ;;  %993 = vst.msk [vmem:[#allocation2 + $0x68] sm:$0xff] %vm979_vm6, %v958_v14  ;;  %v2040_v17 = vld [vmem:[#allocation2 + $0x58] sm:$0xff] }
 0x150   : > { %992 = vst.msk [vmem:[#allocation2 + $0x60] sm:$0xff] %vm979_vm6, %v956_v15  ;;  %2886 = vmatmul.mubr.msk.bf16.gmra.mrb[4].mxu1 %vm2065_vm12, %v2040_v17 }
 0x152   : > { %v1263_v9 = vpop.permute.xlu1 %1262 }
 0x153   : > { %v1261_v16 = vpop.permute.xlu0 %1260  ;;  %1298 = vst.msk [vmem:[#allocation2 + $0x68] sm:$0xff] %vm1284_vm7, %v1263_v9 }
 0x154   : > { %1297 = vst.msk [vmem:[#allocation2 + $0x60] sm:$0xff] %vm1284_vm7, %v1261_v16 }
 0x156   : > { %v1376_v18 = vpop.permute.xlu1 %1375 }
 0x157   : > { %v1374_v19 = vpop.permute.xlu0 %1373  ;;  %1411 = vst.msk [vmem:[#allocation2 + $0x68] sm:$0xff] %vm1397_vm8, %v1376_v18 }
 0x158   : > { %1410 = vst.msk [vmem:[#allocation2 + $0x60] sm:$0xff] %vm1397_vm8, %v1374_v19 }
 0x15a   : > { %v1573_v21 = vpop.permute.xlu1 %1572 }
 0x15b   : > { %v1571_v47 = vpop.permute.xlu0 %1570  ;;  %1608 = vst.msk [vmem:[#allocation2 + $0x68] sm:$0xff] %vm1594_vm9, %v1573_v21 }
 0x15c   : > { %1607 = vst.msk [vmem:[#allocation2 + $0x60] sm:$0xff] %vm1594_vm9, %v1571_v47 }
 0x15e   : > { %v1878_v7 = vpop.permute.xlu1 %1877 }
 0x15f   : > { %v1876_v49 = vpop.permute.xlu0 %1875  ;;  %1913 = vst.msk [vmem:[#allocation2 + $0x68] sm:$0xff] %vm1899_vm10, %v1878_v7 }
 0x160   : > { %1912 = vst.msk [vmem:[#allocation2 + $0x60] sm:$0xff] %vm1899_vm10, %v1876_v49 }
 0x162   : > { %v649_v8 = vpop.permute.xlu1 %648 }
 0x163   : > { %v1989_v22 = vpop.permute.xlu0 %1988  ;;  %683 = vst.msk [vmem:[#allocation2 + $0x70] sm:$0xff] %vm668_vm4, %v649_v8 }
 0x164   : > { %2025 = vst.msk [vmem:[#allocation2 + $0x60] sm:$0xff] %vm2012_vm11, %v1989_v22 }
 0x166   : > { %v651_v23 = vpop.permute.xlu1 %650 }
 0x167   : > { %v1991_v24 = vpop.permute.xlu0 %1990  ;;  %684 = vst.msk [vmem:[#allocation2 + $0x78] sm:$0xff] %vm668_vm4, %v651_v23 }
 0x168   : > { %2026 = vst.msk [vmem:[#allocation2 + $0x68] sm:$0xff] %vm2012_vm11, %v1991_v24 }
 0x16a   : > { %v765_v25 = vpop.permute.xlu1 %764 }
 0x16b   : > { %v763_v26 = vpop.permute.xlu0 %762  ;;  %798 = vst.msk [vmem:[#allocation2 + $0x78] sm:$0xff] %vm782_vm5, %v765_v25  ;;  %v2041_v27 = vld [vmem:[#allocation2 + $0x60] sm:$0xff] }
 0x16c   : > { %797 = vst.msk [vmem:[#allocation2 + $0x70] sm:$0xff] %vm782_vm5, %v763_v26  ;;  %2889 = vmatprep.mubr.msk.bf16.mxu1 %vm2065_vm12, %v2041_v27 }
 0x16e   : > { %v962_v28 = vpop.permute.xlu1 %961 }
 0x16f   : > { %v960_v30 = vpop.permute.xlu0 %959  ;;  %995 = vst.msk [vmem:[#allocation2 + $0x78] sm:$0xff] %vm979_vm6, %v962_v28  ;;  %v2042_v31 = vld [vmem:[#allocation2 + $0x68] sm:$0xff] }
 0x170   : > { %994 = vst.msk [vmem:[#allocation2 + $0x70] sm:$0xff] %vm979_vm6, %v960_v30  ;;  %2890 = vmatmul.mubr.msk.bf16.gmra.mrb[8].mxu1 %vm2065_vm12, %v2042_v31 }
 0x172   : > { %v1267_v33 = vpop.permute.xlu1 %1266 }
 0x173   : > { %v1265_v35 = vpop.permute.xlu0 %1264  ;;  %1300 = vst.msk [vmem:[#allocation2 + $0x78] sm:$0xff] %vm1284_vm7, %v1267_v33 }
 0x174   : > { %1299 = vst.msk [vmem:[#allocation2 + $0x70] sm:$0xff] %vm1284_vm7, %v1265_v35 }
 0x176   : > { %v1380_v36 = vpop.permute.xlu1 %1379 }
 0x177   : > { %v1378_v29 = vpop.permute.xlu0 %1377  ;;  %1413 = vst.msk [vmem:[#allocation2 + $0x78] sm:$0xff] %vm1397_vm8, %v1380_v36 }
 0x178   : > { %1412 = vst.msk [vmem:[#allocation2 + $0x70] sm:$0xff] %vm1397_vm8, %v1378_v29 }
 0x17a   : > { %v1577_v39 = vpop.permute.xlu1 %1576 }
 0x17b   : > { %v1575_v40 = vpop.permute.xlu0 %1574  ;;  %1610 = vst.msk [vmem:[#allocation2 + $0x78] sm:$0xff] %vm1594_vm9, %v1577_v39 }
 0x17c   : > { %1609 = vst.msk [vmem:[#allocation2 + $0x70] sm:$0xff] %vm1594_vm9, %v1575_v40 }
 0x17e   : > { %v1882_v41 = vpop.permute.xlu1 %1881 }
 0x17f   : > { %v1880_v42 = vpop.permute.xlu0 %1879  ;;  %1915 = vst.msk [vmem:[#allocation2 + $0x78] sm:$0xff] %vm1899_vm10, %v1882_v41 }
 0x180   : > { %1914 = vst.msk [vmem:[#allocation2 + $0x70] sm:$0xff] %vm1899_vm10, %v1880_v42 }
 0x182   : > { %v1995_v43 = vpop.permute.xlu1 %1994 }
 0x183   : > { %v1993_v45 = vpop.permute.xlu0 %1992  ;;  %v2867_v46 = vpop.f32.mrb[0].mxu0  ;;  %2028 = vst.msk [vmem:[#allocation2 + $0x78] sm:$0xff] %vm2012_vm11, %v1995_v43 }
 0x184   : > { %2027 = vst.msk [vmem:[#allocation2 + $0x70] sm:$0xff] %vm2012_vm11, %v1993_v45  ;;  %v2152_v34 = vpop.f32.mrb[1].mxu0  ;;  %v2385_v48 = vmul.f32 %v2867_v46, %v2867_v46  ;;  %v2315_v54 = vsel %vm2279_vm13, %v2867_v46, 0.0 }
 0x185   : > { %2282 = vst.msk [vmem:[%s3925_s10 + $0x10] sm:$0xff] %vm2279_vm13, %v2867_v46  ;;  %2280 = vst.msk [vmem:[%s3925_s10] sm:$0xff] %vm2279_vm13, %v2152_v34  ;;  %v2383_v44 = vmul.f32 %v2152_v34, %v2152_v34  ;;  %v2868_v37 = vpop.f32.mrb[2].mxu0  ;;  %v2312_v32 = vsel %vm2279_vm13, %v2152_v34, 0.0 }
 0x186   : > { %2283 = vst.msk [vmem:[%s3925_s10 + $0x18] sm:$0xff] %vm2279_vm13, %v2868_v37  ;;  %v2155_v52 = vpop.f32.mrb[3].mxu0  ;;  %v2386_v56 = vmul.f32 %v2868_v37, %v2868_v37  ;;  %v2418_v59 = vsel %vm2279_vm13, %v2385_v48, 0.0  ;;  %v2317_v61 = vsel %vm2279_vm13, %v2868_v37, 0.0 }
 0x187   : > { %2281 = vst.msk [vmem:[%s3925_s10 + $0x8] sm:$0xff] %vm2279_vm13, %v2155_v52  ;;  %v2313_v50 = vsel %vm2279_vm13, %v2155_v52, 0.0  ;;  %v2384_v51 = vmul.f32 %v2155_v52, %v2155_v52  ;;  %v2415_v55 = vsel %vm2279_vm13, %v2383_v44, 0.0 }
 0x188   : > { %v2314_v53 = vadd.f32 %v2313_v50, %v2312_v32  ;;  %v2420_v11 = vsel %vm2279_vm13, %v2386_v56, 0.0 }
 0x189   : > { %v2416_v57 = vsel %vm2279_vm13, %v2384_v51, 0.0 }
 0x18a   : > { %v2316_v38 = vadd.f32 %v2315_v54, %v2314_v53  ;;  %v2417_v58 = vadd.f32 %v2416_v57, %v2415_v55  ;;  %v2044_v20 = vld [vmem:[#allocation2 + $0x78] sm:$0xff] }
 0x18b   : > { %v2043_v60 = vld [vmem:[#allocation2 + $0x70] sm:$0xff] }
 0x18c   : > { %v2419_v62 = vadd.f32 %v2418_v59, %v2417_v58  ;;  %2893 = vmatprep.mubr.msk.bf16.mxu1 %vm2065_vm12, %v2043_v60  ;;  %v2318_v63 = vadd.f32 %v2317_v61, %v2316_v38 }
 0x18d   : > { %2894 = vmatmul.mubr.msk.bf16.gmra.mrb[12].mxu1 %vm2065_vm12, %v2044_v20 }
 0x18e   : > { %v2421_v0 = vadd.f32 %v2420_v11, %v2419_v62 }
 0x1a3   : > { %v2871_v2 = vpop.f32.mrb[4].mxu0 }
 0x1a4   : > { %2286 = vst.msk [vmem:[%s3925_s10 + $0x30] sm:$0xff] %vm2279_vm13, %v2871_v2  ;;  %v2168_v3 = vpop.f32.mrb[5].mxu0  ;;  %v2389_v1 = vmul.f32 %v2871_v2, %v2871_v2  ;;  %v2323_v16 = vsel %vm2279_vm13, %v2871_v2, 0.0 }
 0x1a5   : > { %2284 = vst.msk [vmem:[%s3925_s10 + $0x20] sm:$0xff] %vm2279_vm13, %v2168_v3  ;;  %v2319_v4 = vsel %vm2279_vm13, %v2168_v3, 0.0  ;;  %v2387_v5 = vmul.f32 %v2168_v3, %v2168_v3  ;;  %v2872_v6 = vpop.f32.mrb[6].mxu0 }
 0x1a6   : > { %v2320_v10 = vadd.f32 %v2319_v4, %v2318_v63  ;;  %2287 = vst.msk [vmem:[%s3925_s10 + $0x38] sm:$0xff] %vm2279_vm13, %v2872_v6  ;;  %v2171_v12 = vpop.f32.mrb[7].mxu0  ;;  %v2390_v18 = vmul.f32 %v2872_v6, %v2872_v6  ;;  %v2426_v7 = vsel %vm2279_vm13, %v2389_v1, 0.0  ;;  %v2325_v49 = vsel %vm2279_vm13, %v2872_v6, 0.0 }
 0x1a7   : > { %v2422_v13 = vsel %vm2279_vm13, %v2387_v5, 0.0  ;;  %2285 = vst.msk [vmem:[%s3925_s10 + $0x28] sm:$0xff] %vm2279_vm13, %v2171_v12  ;;  %v2321_v14 = vsel %vm2279_vm13, %v2171_v12, 0.0  ;;  %v2388_v15 = vmul.f32 %v2171_v12, %v2171_v12 }
 0x1a8   : > { %v2423_v17 = vadd.f32 %v2422_v13, %v2421_v0  ;;  %v2322_v9 = vadd.f32 %v2321_v14, %v2320_v10  ;;  %v2428_v23 = vsel %vm2279_vm13, %v2390_v18, 0.0 }
 0x1a9   : > { %v2424_v19 = vsel %vm2279_vm13, %v2388_v15, 0.0 }
 0x1aa   : > { %v2324_v21 = vadd.f32 %v2323_v16, %v2322_v9  ;;  %v2425_v47 = vadd.f32 %v2424_v19, %v2423_v17 }
 0x1ac   : > { %v2427_v8 = vadd.f32 %v2426_v7, %v2425_v47  ;;  %v2326_v22 = vadd.f32 %v2325_v49, %v2324_v21 }
 0x1ae   : > { %v2429_v24 = vadd.f32 %v2428_v23, %v2427_v8 }
 0x1c3   : > { %v2875_v25 = vpop.f32.mrb[8].mxu0 }
 0x1c4   : > { %2290 = vst.msk [vmem:[%s3925_s10 + $0x50] sm:$0xff] %vm2279_vm13, %v2875_v25  ;;  %v2184_v26 = vpop.f32.mrb[9].mxu0  ;;  %v2393_v35 = vmul.f32 %v2875_v25, %v2875_v25  ;;  %v2331_v42 = vsel %vm2279_vm13, %v2875_v25, 0.0 }
 0x1c5   : > { %2288 = vst.msk [vmem:[%s3925_s10 + $0x40] sm:$0xff] %vm2279_vm13, %v2184_v26  ;;  %v2327_v27 = vsel %vm2279_vm13, %v2184_v26, 0.0  ;;  %v2391_v28 = vmul.f32 %v2184_v26, %v2184_v26  ;;  %v2876_v30 = vpop.f32.mrb[10].mxu0 }
 0x1c6   : > { %v2328_v31 = vadd.f32 %v2327_v27, %v2326_v22  ;;  %2291 = vst.msk [vmem:[%s3925_s10 + $0x58] sm:$0xff] %vm2279_vm13, %v2876_v30  ;;  %v2187_v33 = vpop.f32.mrb[11].mxu0  ;;  %v2394_v43 = vmul.f32 %v2876_v30, %v2876_v30  ;;  %v2434_v44 = vsel %vm2279_vm13, %v2393_v35, 0.0  ;;  %v2333_v37 = vsel %vm2279_vm13, %v2876_v30, 0.0 }
 0x1c7   : > { %v2430_v36 = vsel %vm2279_vm13, %v2391_v28, 0.0  ;;  %2289 = vst.msk [vmem:[%s3925_s10 + $0x48] sm:$0xff] %vm2279_vm13, %v2187_v33  ;;  %v2329_v29 = vsel %vm2279_vm13, %v2187_v33, 0.0  ;;  %v2392_v39 = vmul.f32 %v2187_v33, %v2187_v33 }
 0x1c8   : > { %v2431_v40 = vadd.f32 %v2430_v36, %v2429_v24  ;;  %v2330_v41 = vadd.f32 %v2329_v29, %v2328_v31  ;;  %v2436_v32 = vsel %vm2279_vm13, %v2394_v43, 0.0 }
 0x1c9   : > { %v2432_v45 = vsel %vm2279_vm13, %v2392_v39, 0.0 }
 0x1ca   : > { %v2332_v46 = vadd.f32 %v2331_v42, %v2330_v41  ;;  %v2433_v34 = vadd.f32 %v2432_v45, %v2431_v40 }
 0x1cc   : > { %v2435_v52 = vadd.f32 %v2434_v44, %v2433_v34  ;;  %v2334_v48 = vadd.f32 %v2333_v37, %v2332_v46 }
 0x1ce   : > { %v2437_v50 = vadd.f32 %v2436_v32, %v2435_v52 }
 0x1e3   : > { %v2879_v51 = vpop.f32.mrb[12].mxu0 }
 0x1e4   : > { %2294 = vst.msk [vmem:[%s3925_s10 + $0x70] sm:$0xff] %vm2279_vm13, %v2879_v51  ;;  %v2200_v53 = vpop.f32.mrb[13].mxu0  ;;  %v2397_v58 = vmul.f32 %v2879_v51, %v2879_v51  ;;  %v2339_v63 = vsel %vm2279_vm13, %v2879_v51, 0.0 }
 0x1e5   : > { %2292 = vst.msk [vmem:[%s3925_s10 + $0x60] sm:$0xff] %vm2279_vm13, %v2200_v53  ;;  %v2335_v54 = vsel %vm2279_vm13, %v2200_v53, 0.0  ;;  %v2395_v55 = vmul.f32 %v2200_v53, %v2200_v53  ;;  %v2880_v56 = vpop.f32.mrb[14].mxu0 }
 0x1e6   : > { %v2336_v57 = vadd.f32 %v2335_v54, %v2334_v48  ;;  %2295 = vst.msk [vmem:[%s3925_s10 + $0x78] sm:$0xff] %vm2279_vm13, %v2880_v56  ;;  %v2203_v38 = vpop.f32.mrb[15].mxu0  ;;  %v2398_v11 = vmul.f32 %v2880_v56, %v2880_v56  ;;  %v2442_v4 = vsel %vm2279_vm13, %v2397_v58, 0.0  ;;  %v2341_v5 = vsel %vm2279_vm13, %v2880_v56, 0.0 }
 0x1e7   : > { %v2438_v20 = vsel %vm2279_vm13, %v2395_v55, 0.0  ;;  %2293 = vst.msk [vmem:[%s3925_s10 + $0x68] sm:$0xff] %vm2279_vm13, %v2203_v38  ;;  %v2337_v59 = vsel %vm2279_vm13, %v2203_v38, 0.0  ;;  %v2396_v61 = vmul.f32 %v2203_v38, %v2203_v38 }
 0x1e8   : > { %v2439_v60 = vadd.f32 %v2438_v20, %v2437_v50  ;;  %v2338_v62 = vadd.f32 %v2337_v59, %v2336_v57  ;;  %v2444_v12 = vsel %vm2279_vm13, %v2398_v11, 0.0 }
 0x1e9   : > { %v2440_v0 = vsel %vm2279_vm13, %v2396_v61, 0.0 }
 0x1ea   : > { %v2340_v2 = vadd.f32 %v2339_v63, %v2338_v62  ;;  %v2441_v3 = vadd.f32 %v2440_v0, %v2439_v60 }
 0x1ec   : > { %v2443_v6 = vadd.f32 %v2442_v4, %v2441_v3  ;;  %v2342_v10 = vadd.f32 %v2341_v5, %v2340_v2 }
 0x1ee   : > { %v2445_v1 = vadd.f32 %v2444_v12, %v2443_v6 }
 0x203   : > { %v2883_v13 = vpop.f32.mrb[0].mxu1 }
 0x204   : > { %2298 = vst.msk [vmem:[%s3925_s10 + $0x90] sm:$0xff] %vm2279_vm13, %v2883_v13  ;;  %v2216_v14 = vpop.f32.mrb[1].mxu1  ;;  %v2401_v19 = vmul.f32 %v2883_v13, %v2883_v13  ;;  %v2347_v22 = vsel %vm2279_vm13, %v2883_v13, 0.0 }
 0x205   : > { %2296 = vst.msk [vmem:[%s3925_s10 + $0x80] sm:$0xff] %vm2279_vm13, %v2216_v14  ;;  %v2343_v15 = vsel %vm2279_vm13, %v2216_v14, 0.0  ;;  %v2399_v17 = vmul.f32 %v2216_v14, %v2216_v14  ;;  %v2884_v9 = vpop.f32.mrb[2].mxu1 }
 0x206   : > { %v2344_v16 = vadd.f32 %v2343_v15, %v2342_v10  ;;  %2299 = vst.msk [vmem:[%s3925_s10 + $0x98] sm:$0xff] %vm2279_vm13, %v2884_v9  ;;  %v2219_v18 = vpop.f32.mrb[3].mxu1  ;;  %v2402_v23 = vmul.f32 %v2884_v9, %v2884_v9  ;;  %v2450_v27 = vsel %vm2279_vm13, %v2401_v19, 0.0  ;;  %v2349_v28 = vsel %vm2279_vm13, %v2884_v9, 0.0 }
 0x207   : > { %v2446_v21 = vsel %vm2279_vm13, %v2399_v17, 0.0  ;;  %2297 = vst.msk [vmem:[%s3925_s10 + $0x88] sm:$0xff] %vm2279_vm13, %v2219_v18  ;;  %v2345_v47 = vsel %vm2279_vm13, %v2219_v18, 0.0  ;;  %v2400_v7 = vmul.f32 %v2219_v18, %v2219_v18 }
 0x208   : > { %v2447_v49 = vadd.f32 %v2446_v21, %v2445_v1  ;;  %v2346_v8 = vadd.f32 %v2345_v47, %v2344_v16  ;;  %v2452_v33 = vsel %vm2279_vm13, %v2402_v23, 0.0 }
 0x209   : > { %v2448_v24 = vsel %vm2279_vm13, %v2400_v7, 0.0 }
 0x20a   : > { %v2348_v25 = vadd.f32 %v2347_v22, %v2346_v8  ;;  %v2449_v26 = vadd.f32 %v2448_v24, %v2447_v49 }
 0x20c   : > { %v2451_v30 = vadd.f32 %v2450_v27, %v2449_v26  ;;  %v2350_v31 = vadd.f32 %v2349_v28, %v2348_v25 }
 0x20e   : > { %v2453_v35 = vadd.f32 %v2452_v33, %v2451_v30 }
 0x223   : > { %v2887_v36 = vpop.f32.mrb[4].mxu1 }
 0x224   : > { %2302 = vst.msk [vmem:[%s3925_s10 + $0xb0] sm:$0xff] %vm2279_vm13, %v2887_v36  ;;  %v2232_v29 = vpop.f32.mrb[5].mxu1  ;;  %v2405_v45 = vmul.f32 %v2887_v36, %v2887_v36  ;;  %v2355_v48 = vsel %vm2279_vm13, %v2887_v36, 0.0 }
 0x225   : > { %2300 = vst.msk [vmem:[%s3925_s10 + $0xa0] sm:$0xff] %vm2279_vm13, %v2232_v29  ;;  %v2351_v39 = vsel %vm2279_vm13, %v2232_v29, 0.0  ;;  %v2403_v40 = vmul.f32 %v2232_v29, %v2232_v29  ;;  %v2888_v41 = vpop.f32.mrb[6].mxu1 }
 0x226   : > { %v2352_v42 = vadd.f32 %v2351_v39, %v2350_v31  ;;  %2303 = vst.msk [vmem:[%s3925_s10 + $0xb8] sm:$0xff] %vm2279_vm13, %v2888_v41  ;;  %v2235_v43 = vpop.f32.mrb[7].mxu1  ;;  %v2406_v32 = vmul.f32 %v2888_v41, %v2888_v41  ;;  %v2458_v54 = vsel %vm2279_vm13, %v2405_v45, 0.0  ;;  %v2357_v55 = vsel %vm2279_vm13, %v2888_v41, 0.0 }
 0x227   : > { %v2454_v46 = vsel %vm2279_vm13, %v2403_v40, 0.0  ;;  %2301 = vst.msk [vmem:[%s3925_s10 + $0xa8] sm:$0xff] %vm2279_vm13, %v2235_v43  ;;  %v2353_v34 = vsel %vm2279_vm13, %v2235_v43, 0.0  ;;  %v2404_v44 = vmul.f32 %v2235_v43, %v2235_v43 }
 0x228   : > { %v2455_v37 = vadd.f32 %v2454_v46, %v2453_v35  ;;  %v2354_v52 = vadd.f32 %v2353_v34, %v2352_v42  ;;  %v2460_v38 = vsel %vm2279_vm13, %v2406_v32, 0.0 }
 0x229   : > { %v2456_v50 = vsel %vm2279_vm13, %v2404_v44, 0.0 }
 0x22a   : > { %v2356_v51 = vadd.f32 %v2355_v48, %v2354_v52  ;;  %v2457_v53 = vadd.f32 %v2456_v50, %v2455_v37 }
 0x22c   : > { %v2459_v56 = vadd.f32 %v2458_v54, %v2457_v53  ;;  %v2358_v57 = vadd.f32 %v2357_v55, %v2356_v51 }
 0x22e   : > { %v2461_v58 = vadd.f32 %v2460_v38, %v2459_v56 }
 0x243   : > { %v2891_v20 = vpop.f32.mrb[8].mxu1 }
 0x244   : > { %2306 = vst.msk [vmem:[%s3925_s10 + $0xd0] sm:$0xff] %vm2279_vm13, %v2891_v20  ;;  %v2248_v59 = vpop.f32.mrb[9].mxu1  ;;  %v2409_v0 = vmul.f32 %v2891_v20, %v2891_v20  ;;  %v2363_v10 = vsel %vm2279_vm13, %v2891_v20, 0.0 }
 0x245   : > { %2304 = vst.msk [vmem:[%s3925_s10 + $0xc0] sm:$0xff] %vm2279_vm13, %v2248_v59  ;;  %v2359_v61 = vsel %vm2279_vm13, %v2248_v59, 0.0  ;;  %v2407_v60 = vmul.f32 %v2248_v59, %v2248_v59  ;;  %v2892_v62 = vpop.f32.mrb[10].mxu1 }
 0x246   : > { %v2360_v63 = vadd.f32 %v2359_v61, %v2358_v57  ;;  %2307 = vst.msk [vmem:[%s3925_s10 + $0xd8] sm:$0xff] %vm2279_vm13, %v2892_v62  ;;  %v2251_v11 = vpop.f32.mrb[11].mxu1  ;;  %v2410_v12 = vmul.f32 %v2892_v62, %v2892_v62  ;;  %v2466_v15 = vsel %vm2279_vm13, %v2409_v0, 0.0  ;;  %v2365_v17 = vsel %vm2279_vm13, %v2892_v62, 0.0 }
 0x247   : > { %v2462_v2 = vsel %vm2279_vm13, %v2407_v60, 0.0  ;;  %2305 = vst.msk [vmem:[%s3925_s10 + $0xc8] sm:$0xff] %vm2279_vm13, %v2251_v11  ;;  %v2361_v3 = vsel %vm2279_vm13, %v2251_v11, 0.0  ;;  %v2408_v4 = vmul.f32 %v2251_v11, %v2251_v11 }
 0x248   : > { %v2463_v5 = vadd.f32 %v2462_v2, %v2461_v58  ;;  %v2362_v6 = vadd.f32 %v2361_v3, %v2360_v63  ;;  %v2468_v18 = vsel %vm2279_vm13, %v2410_v12, 0.0 }
 0x249   : > { %v2464_v1 = vsel %vm2279_vm13, %v2408_v4, 0.0 }
 0x24a   : > { %v2364_v13 = vadd.f32 %v2363_v10, %v2362_v6  ;;  %v2465_v14 = vadd.f32 %v2464_v1, %v2463_v5 }
 0x24c   : > { %v2467_v9 = vadd.f32 %v2466_v15, %v2465_v14  ;;  %v2366_v16 = vadd.f32 %v2365_v17, %v2364_v13 }
 0x24e   : > { %v2469_v19 = vadd.f32 %v2468_v18, %v2467_v9 }
 0x260   : > { %v2895_v21 = vpop.f32.mrb[12].mxu1 }
 0x261   : > { %2310 = vst.msk [vmem:[%s3925_s10 + $0xf0] sm:$0xff] %vm2279_vm13, %v2895_v21  ;;  %v2264_v47 = vpop.f32.mrb[13].mxu1  ;;  %v2413_v24 = vmul.f32 %v2895_v21, %v2895_v21  ;;  %v2371_v31 = vsel %vm2279_vm13, %v2895_v21, 0.0 }
 0x262   : > { %2308 = vst.msk [vmem:[%s3925_s10 + $0xe0] sm:$0xff] %vm2279_vm13, %v2264_v47  ;;  %v2367_v7 = vsel %vm2279_vm13, %v2264_v47, 0.0  ;;  %v2411_v49 = vmul.f32 %v2264_v47, %v2264_v47  ;;  %v2896_v8 = vpop.f32.mrb[14].mxu1 }
 0x263   : > { %v2368_v22 = vadd.f32 %v2367_v7, %v2366_v16  ;;  %2311 = vst.msk [vmem:[%s3925_s10 + $0xf8] sm:$0xff] %vm2279_vm13, %v2896_v8  ;;  %v2267_v23 = vpop.f32.mrb[15].mxu1  ;;  %v2414_v33 = vmul.f32 %v2896_v8, %v2896_v8  ;;  %v2474_v39 = vsel %vm2279_vm13, %v2413_v24, 0.0  ;;  %v2373_v40 = vsel %vm2279_vm13, %v2896_v8, 0.0 }
 0x264   : > { %v2470_v25 = vsel %vm2279_vm13, %v2411_v49, 0.0  ;;  %2309 = vst.msk [vmem:[%s3925_s10 + $0xe8] sm:$0xff] %vm2279_vm13, %v2267_v23  ;;  %v2369_v26 = vsel %vm2279_vm13, %v2267_v23, 0.0  ;;  %v2412_v27 = vmul.f32 %v2267_v23, %v2267_v23 }
 0x265   : > { %v2471_v28 = vadd.f32 %v2470_v25, %v2469_v19  ;;  %v2370_v30 = vadd.f32 %v2369_v26, %v2368_v22  ;;  %v2476_v43 = vsel %vm2279_vm13, %v2414_v33, 0.0 }
 0x266   : > { %v2472_v35 = vsel %vm2279_vm13, %v2412_v27, 0.0 }
 0x267   : > { %v2372_v36 = vadd.f32 %v2371_v31, %v2370_v30  ;;  %v2473_v29 = vadd.f32 %v2472_v35, %v2471_v28 }
 0x269   : > { %v2374_v41 = vadd.f32 %v2373_v40, %v2372_v36  ;;  %v2475_v42 = vadd.f32 %v2474_v39, %v2473_v29 }
 0x26b   : > { %v2375_v45 = vrot.slane %v2374_v41, 4  ;;  %v2477_v46 = vadd.f32 %v2476_v43, %v2475_v42 }
 0x26d   : > { %v2376_v34 = vadd.f32 %v2375_v45, %v2374_v41  ;;  %v2478_v44 = vrot.slane %v2477_v46, 4 }
 0x26f   : > { %v2377_v37 = vrot.slane %v2376_v34, 2  ;;  %v2479_v52 = vadd.f32 %v2478_v44, %v2477_v46 }
 0x271   : > { %v2378_v48 = vadd.f32 %v2377_v37, %v2376_v34  ;;  %v2480_v32 = vrot.slane %v2479_v52, 2 }
 0x273   : > { %v2379_v50 = vrot.slane %v2378_v48, 1  ;;  %v2481_v51 = vadd.f32 %v2480_v32, %v2479_v52 }
 0x275   : > { %v2380_v53 = vadd.f32 %v2379_v50, %v2378_v48  ;;  %v2482_v54 = vrot.slane %v2481_v51, 1 }
 0x277   : > { %2382 = vst.msk [vmem:[%s212_s18] sm:$0x1] %vm2381_vm14, %v2380_v53  ;;  %v2483_v55 = vadd.f32 %v2482_v54, %v2481_v51 }
 0x279   : > { %2484 = vst.msk [vmem:[%s212_s18 + $0x1] sm:$0x1] %vm2381_vm14, %v2483_v55 }
 0x27a PF: > { %s14_s14 = sadd.s32 1, %s3059_s14   ;;  %s4076_s12 = smov %s3055_s13 }
 0x27b   : > { %p11_p5 = scmp.ge.s32.totalorder %s14_s14, 4   ;;  %s4077_s13 = smov %s4079_s15 }
 0x27d   :  { %13 = sbr.rel (!%p11_p5) target bundleno = 2 (0x2), region = 73 }

</bundles_post_ra>
